<compile_context>
chip_gen: v7x
topology: tpu7x:2x2x1
jax: 0.10.0
libtpu: 0.0.40
codegen_flags: <defaults>
</compile_context>

<pallas_src>
import functools

import jax
import jax.numpy as jnp
from jax import lax
from jax.experimental import pallas as pl
from jax.experimental.pallas import tpu as pltpu


def _round_up(x, m):
    return (x + m - 1) // m * m


def _prefers_direct_residual():
    """v5e (128-deep MXU, single store slot): skip the residual im2col slab."""
    try:
        kind = jax.devices()[0].device_kind.lower()
    except Exception:
        return False
    return ("v5 lite" in kind) or ("v5lite" in kind) or ("v5e" in kind)


def _half_encoder_kernel(x_ref,               # (M, K1p) cdt  first-conv im2col (one image)
                         w0_ref, b0_ref,      # (K1p, Cp) cdt, (1, Cp) f32
                         r1w3_ref, r1b3_ref,  # (9*Cp, Cp) cdt, (1, Cp) f32
                         r1w1_ref, r1b1_ref,  # (Cp, Cp) cdt,   (1, Cp) f32
                         r2w3_ref, r2b3_ref,  # residual2 3x3
                         r2w1_ref, r2b1_ref,  # residual2 1x1
                         out_ref,             # (M, Cp) f32
                         rp_ref,              # (M, 3*Cp) cdt slab (tiny dummy if unused)
                         hpad_ref,            # (Ho+2, Wp, Cp) f32 padded activations
                         *, Ho, Wo, use_slab, compute_dtype):
    Cp = out_ref.shape[-1]
    Wp = hpad_ref.shape[1]
    M = Ho * Wo
    cdt = compute_dtype

    # ---- stride-2 3x3 conv: ONE fused MXU matmul over the wrapper-built
    #      im2col slab (K = round_up(9*Cin, 128)), f32 accumulation. ----------
    h = jnp.dot(x_ref[...], w0_ref[...],
                preferred_element_type=jnp.float32) + b0_ref[...]

    # Zero only the 1-pixel halo of the padded activation scratch, once per
    # image.  The interior is fully overwritten by each residual before it is
    # read; columns >= Wo+2 (sublane-alignment padding) are never read.
    hpad_ref[0:1, :, :] = jnp.zeros((1, Wp, Cp), jnp.float32)
    hpad_ref[Ho + 1:Ho + 2, :, :] = jnp.zeros((1, Wp, Cp), jnp.float32)
    hpad_ref[:, 0:1, :] = jnp.zeros((Ho + 2, 1, Cp), jnp.float32)
    hpad_ref[:, Wo + 1:Wo + 2, :] = jnp.zeros((Ho + 2, 1, Cp), jnp.float32)

    def residual(h_f32, w3_ref, b3_ref, w1_ref, b1_ref):
        # ReLU -> 3x3 conv (pad 1) -> ReLU -> 1x1 conv, f32 accumulation.
        a = jnp.maximum(h_f32, 0.0)
        hpad_ref[1:Ho + 1, 1:Wo + 1, :] = a.reshape(Ho, Wo, Cp)
        acc = b3_ref[...]                                # (1, Cp) f32, broadcasts
        if use_slab:
            # Per ky row-group: 3 lane-aligned 128-wide column stores into a
            # reusable (M, 3*Cp) cdt slab, then one accumulating K=3*Cp dot.
            for ky in range(3):
                for kx in range(3):
                    rp_ref[:, kx * Cp:(kx + 1) * Cp] = (
                        hpad_ref[ky:ky + Ho, kx:kx + Wo, :]
                        .reshape(M, Cp).astype(cdt))
                acc = acc + jnp.dot(
                    rp_ref[...], w3_ref[ky * 3 * Cp:(ky + 1) * 3 * Cp, :],
                    preferred_element_type=jnp.float32)
        else:
            # v5e path: no slab; 9 accumulating K=Cp dots straight from the
            # shifted windows (K=Cp=128 already fills the 128-deep MXU).
            for k in range(9):
                ky, kx = divmod(k, 3)
                win = (hpad_ref[ky:ky + Ho, kx:kx + Wo, :]
                       .reshape(M, Cp).astype(cdt))
                acc = acc + jnp.dot(
                    win, w3_ref[k * Cp:(k + 1) * Cp, :],
                    preferred_element_type=jnp.float32)
        a2 = jnp.maximum(acc, 0.0).astype(cdt)
        return jnp.dot(a2, w1_ref[...],
                       preferred_element_type=jnp.float32) + b1_ref[...]

    # x = x + residual1(x) ; x = x + residual2(x)
    h = h + residual(h, r1w3_ref, r1b3_ref, r1w1_ref, r1b1_ref)
    h = h + residual(h, r2w3_ref, r2b3_ref, r2w1_ref, r2b1_ref)
    out_ref[...] = h.astype(out_ref.dtype)


def half_encoder_forward(x_nchw, params, *,
                         compute_dtype=jnp.bfloat16, use_slab=None):
    """Pallas HalfEncoder. x: (N, Cin, H, W) f32 -> (N, Cout, H//2, W//2) f32."""
    (w0, b0, r1w3, r1b3, r1w1, r1b1, r2w3, r2b3, r2w1, r2b1) = params  # PyTorch OIHW
    if use_slab is None:
        use_slab = not _prefers_direct_residual()
    N, Cin, H, W = x_nchw.shape
    Cout = w0.shape[0]
    Ho = (H + 2 - 3) // 2 + 1
    Wo = (W + 2 - 3) // 2 + 1
    M = Ho * Wo
    Cp = _round_up(Cout, 128)            # lane-dense working / output channels
    K1 = 9 * Cin
    K1p = _round_up(K1, 128)             # lane-dense first-conv contraction
    Wp = _round_up(Wo + 2, 8)            # sublane-aligned padded-activation width
    cdt = compute_dtype

    # ---- first-conv im2col, built once in HBM at OUTPUT resolution ---------
    # Patch column index = (ky*3 + kx)*Cin + ci  <->  x_pad[2*oy+ky, 2*ox+kx, ci].
    x = jnp.transpose(x_nchw, (0, 2, 3, 1))                          # NHWC
    xpad = jnp.pad(x, ((0, 0), (1, 2 * Ho + 1 - H), (1, 2 * Wo + 1 - W), (0, 0)))
    cols = [xpad[:, ky:ky + 2 * Ho:2, kx:kx + 2 * Wo:2, :]
            for ky in range(3) for kx in range(3)]
    xcol = jnp.concatenate(cols, axis=-1)                            # (N, Ho, Wo, 9*Cin)
    xcol = jnp.pad(xcol, ((0, 0), (0, 0), (0, 0), (0, K1p - K1)))
    xcol = xcol.reshape(N, M, K1p).astype(cdt)

    # ---- weights: lane-dense, fused-matmul layouts (zero-padded) -----------
    def pack_bias(b):                                  # (Cout,) -> (1, Cp) f32
        return jnp.zeros((1, Cp), jnp.float32).at[0, :Cout].set(b)

    def pack_w0(w):                                    # (O, Cin, 3, 3) -> (K1p, Cp)
        wt = jnp.transpose(w, (2, 3, 1, 0)).reshape(K1, Cout)        # (ky,kx,ci) x co
        return jnp.zeros((K1p, Cp), jnp.float32).at[:K1, :Cout].set(wt).astype(cdt)

    def pack_w3(w):                                    # (O, O, 3, 3) -> (9*Cp, Cp)
        wt = jnp.transpose(w, (2, 3, 1, 0)).reshape(9, Cout, Cout)   # (k, ci, co)
        full = jnp.zeros((9, Cp, Cp), jnp.float32).at[:, :Cout, :Cout].set(wt)
        return full.reshape(9 * Cp, Cp).astype(cdt)

    def pack_w1(w):                                    # (O, O, 1, 1) -> (Cp, Cp)
        full = jnp.zeros((Cp, Cp), jnp.float32)
        full = full.at[:Cout, :Cout].set(jnp.transpose(w[:, :, 0, 0], (1, 0)))
        return full.astype(cdt)

    args = (xcol,
            pack_w0(w0), pack_bias(b0),
            pack_w3(r1w3), pack_bias(r1b3), pack_w1(r1w1), pack_bias(r1b1),
            pack_w3(r2w3), pack_bias(r2b3), pack_w1(r2w1), pack_bias(r2b1))

    resident = lambda n: (0, 0)          # weights/biases: same block every grid step
    in_specs = [pl.BlockSpec((None, M, K1p), lambda n: (n, 0, 0))]
    in_specs += [pl.BlockSpec(a.shape, resident) for a in args[1:]]

    # VMEM budget: computed from the actual per-step footprint (double-buffered
    # I/O + resident weights + scratches + live f32 temporaries) with margin,
    # rather than a hard-coded 64 MiB.
    isz = jnp.dtype(cdt).itemsize
    slab_rows = M if use_slab else 8
    est = (2 * M * K1p * isz                                  # input block x2
           + 2 * M * Cp * 4                                   # output block x2
           + 2 * ((K1p + 20 * Cp) * Cp * isz + 5 * Cp * 4)    # weights + biases x2
           + slab_rows * 3 * Cp * isz                         # residual im2col slab
           + (Ho + 2) * Wp * Cp * 4                           # padded activations
           + 8 * M * Cp * 4)                                  # live f32 temporaries
    vmem_limit = int(min(max(2 * est, 32 * 1024 * 1024), 100 * 1024 * 1024))

    kernel = functools.partial(_half_encoder_kernel, Ho=Ho, Wo=Wo,
                               use_slab=use_slab, compute_dtype=cdt)

    out_flat = pl.pallas_call(
        kernel,
        grid=(N,),                                    # one image per grid step
        out_shape=jax.ShapeDtypeStruct((N, M, Cp), jnp.float32),
        in_specs=in_specs,
        out_specs=pl.BlockSpec((None, M, Cp), lambda n: (n, 0, 0)),
        scratch_shapes=[
            pltpu.VMEM((slab_rows, 3 * Cp), cdt),             # residual im2col slab
            pltpu.VMEM((Ho + 2, Wp, Cp), jnp.float32),        # zero-padded activations
        ],
        compiler_params=pltpu.CompilerParams(
            dimension_semantics=("parallel",),        # batch across TCs (v7x megacore)
            vmem_limit_bytes=vmem_limit),
    )(*args)

    out = out_flat.reshape(N, Ho, Wo, Cp)[:, :, :, :Cout]
    return jnp.transpose(out, (0, 3, 1, 2))           # back to NCHW


def half_encoder_ref(x, params):
    """Pure-JAX reference mirroring the PyTorch module (NCHW / OIHW)."""
    (w0, b0, r1w3, r1b3, r1w1, r1b1, r2w3, r2b3, r2w1, r2b1) = params

    def conv(x, w, b, stride, pad):
        y = lax.conv_general_dilated(x, w, (stride, stride),
                                     [(pad, pad), (pad, pad)],
                                     dimension_numbers=('NCHW', 'OIHW', 'NCHW'))
        return y + b[None, :, None, None]

    def resid(h, w3, b3, w1, b1):
        a = jnp.maximum(h, 0.0)
        a = conv(a, w3, b3, 1, 1)
        a = jnp.maximum(a, 0.0)
        return conv(a, w1, b1, 1, 0)

    h = conv(x, w0, b0, 2, 1)
    h = h + resid(h, r1w3, r1b3, r1w1, r1b1)
    h = h + resid(h, r2w3, r2b3, r2w1, r2b1)
    return h


if __name__ == "__main__":
    key = jax.random.PRNGKey(0)
    N, Cin, H, W, Cout = 2, 4, 16, 16, 8
    ks = jax.random.split(key, 11)

    x = jax.random.normal(ks[0], (N, Cin, H, W), jnp.float32)

    def p(k, shape, scale=0.1):
        return scale * jax.random.normal(k, shape, jnp.float32)

    # Deterministic synthetic parameters (PyTorch Conv2d shapes: OIHW + bias).
    params = (
        p(ks[1], (Cout, Cin, 3, 3)),  p(ks[2], (Cout,)),     # self.conv
        p(ks[3], (Cout, Cout, 3, 3)), p(ks[4], (Cout,)),     # residual1 3x3
        p(ks[5], (Cout, Cout, 1, 1)), p(ks[6], (Cout,)),     # residual1 1x1
        p(ks[7], (Cout, Cout, 3, 3)), p(ks[8], (Cout,)),     # residual2 3x3
        p(ks[9], (Cout, Cout, 1, 1)), p(ks[10], (Cout,)),    # residual2 1x1
    )

    ref = half_encoder_ref(x, params)

    # Exact-precision path (f32 matmul operands): tight check vs. the reference.
    out_f32 = jax.jit(functools.partial(half_encoder_forward,
                                        compute_dtype=jnp.float32))(x, params)
    jax.block_until_ready(out_f32)
    assert out_f32.shape == (N, Cout, H // 2, W // 2), out_f32.shape
    err_f32 = float(jnp.max(jnp.abs(out_f32 - ref)))
    if err_f32 > 1e-4:
        raise AssertionError(f"f32 Pallas kernel mismatch vs reference, max abs err = {err_f32}")

    # Default bf16-MXU path (f32 accumulation): loose tolerance vs f32 reference.
    out_bf16 = jax.jit(half_encoder_forward)(x, params)
    jax.block_until_ready(out_bf16)
    assert out_bf16.shape == (N, Cout, H // 2, W // 2), out_bf16.shape
    err_bf16 = float(jnp.max(jnp.abs(out_bf16 - ref)))
    if err_bf16 > 1.5e-1:
        raise AssertionError(f"bf16 Pallas kernel mismatch vs reference, max abs err = {err_bf16}")

    print("KERNEL_OK")
</pallas_src>

<mosaic_0001>
module attributes {stable_mosaic.version = 11 : i64} {
  func.func @_half_encoder_kernel(%arg0: i32, %arg1: memref<1x64x128xf32, #tpu.memory_space<vmem>>, %arg2: memref<128x128xf32, #tpu.memory_space<vmem>>, %arg3: memref<1x128xf32, #tpu.memory_space<vmem>>, %arg4: memref<1152x128xf32, #tpu.memory_space<vmem>>, %arg5: memref<1x128xf32, #tpu.memory_space<vmem>>, %arg6: memref<128x128xf32, #tpu.memory_space<vmem>>, %arg7: memref<1x128xf32, #tpu.memory_space<vmem>>, %arg8: memref<1152x128xf32, #tpu.memory_space<vmem>>, %arg9: memref<1x128xf32, #tpu.memory_space<vmem>>, %arg10: memref<128x128xf32, #tpu.memory_space<vmem>>, %arg11: memref<1x128xf32, #tpu.memory_space<vmem>>, %arg12: memref<1x64x128xf32, #tpu.memory_space<vmem>>, %arg13: memref<64x384xf32, #tpu.memory_space<vmem>>, %arg14: memref<10x16x128xf32, #tpu.memory_space<vmem>>) attributes {dimension_semantics = [#tpu.dimension_semantics<parallel>], iteration_bounds = array<i64: 2>, scalar_prefetch = 0 : i64, scratch_operands = 2 : i64, tpu.core_type = #tpu.core_type<tc>, window_params = [{transform_indices = @transform_0, window_bounds = array<i64: 1, 64, 128>}, {pipeline_mode = #tpu.pipeline_mode<synchronous>, transform_indices = @transform_1, window_bounds = array<i64: 128, 128>}, {pipeline_mode = #tpu.pipeline_mode<synchronous>, transform_indices = @transform_2, window_bounds = array<i64: 1, 128>}, {pipeline_mode = #tpu.pipeline_mode<synchronous>, transform_indices = @transform_3, window_bounds = array<i64: 1152, 128>}, {pipeline_mode = #tpu.pipeline_mode<synchronous>, transform_indices = @transform_4, window_bounds = array<i64: 1, 128>}, {pipeline_mode = #tpu.pipeline_mode<synchronous>, transform_indices = @transform_5, window_bounds = array<i64: 128, 128>}, {pipeline_mode = #tpu.pipeline_mode<synchronous>, transform_indices = @transform_6, window_bounds = array<i64: 1, 128>}, {pipeline_mode = #tpu.pipeline_mode<synchronous>, transform_indices = @transform_7, window_bounds = array<i64: 1152, 128>}, {pipeline_mode = #tpu.pipeline_mode<synchronous>, transform_indices = @transform_8, window_bounds = array<i64: 1, 128>}, {pipeline_mode = #tpu.pipeline_mode<synchronous>, transform_indices = @transform_9, window_bounds = array<i64: 128, 128>}, {pipeline_mode = #tpu.pipeline_mode<synchronous>, transform_indices = @transform_10, window_bounds = array<i64: 1, 128>}, {transform_indices = @transform_11, window_bounds = array<i64: 1, 64, 128>}]} {
    %c0 = arith.constant 0 : index
    %c0_0 = arith.constant 0 : index
    %c0_1 = arith.constant 0 : index
    %0 = vector.load %arg1[%c0, %c0_0, %c0_1] : memref<1x64x128xf32, #tpu.memory_space<vmem>>, vector<1x64x128xf32>
    %1 = vector.shape_cast %0 : vector<1x64x128xf32> to vector<64x128xf32>
    %c0_2 = arith.constant 0 : index
    %c0_3 = arith.constant 0 : index
    %2 = vector.load %arg2[%c0_2, %c0_3] : memref<128x128xf32, #tpu.memory_space<vmem>>, vector<128x128xf32>
    %cst = arith.constant dense<0.000000e+00> : vector<64x128xf32>
    %3 = tpu.matmul %1, %2, %cst {dimension_numbers = #tpu.dot_dimension_numbers<[1], [0], [0], [1], [0, 0, 1, 1], [], []>} : vector<64x128xf32>, vector<128x128xf32>, vector<64x128xf32> -> vector<64x128xf32>
    %c0_4 = arith.constant 0 : index
    %c0_5 = arith.constant 0 : index
    %4 = vector.load %arg3[%c0_4, %c0_5] : memref<1x128xf32, #tpu.memory_space<vmem>>, vector<1x128xf32>
    %5 = vector.broadcast %4 : vector<1x128xf32> to vector<64x128xf32>
    %6 = arith.addf %3, %5 : vector<64x128xf32>
    %cst_6 = arith.constant 0.000000e+00 : f32
    %7 = vector.broadcast %cst_6 : f32 to vector<1x16x128xf32>
    %c0_7 = arith.constant 0 : index
    %c0_8 = arith.constant 0 : index
    %c0_9 = arith.constant 0 : index
    %8 = vector.load %arg14[%c0_7, %c0_8, %c0_9] : memref<10x16x128xf32, #tpu.memory_space<vmem>>, vector<1x16x128xf32>
    tpu.vector_store %arg14[%c0_7, %c0_8, %c0_9], %7 {strides = array<i32>} : memref<10x16x128xf32, #tpu.memory_space<vmem>>, vector<1x16x128xf32>,
    %cst_10 = arith.constant 0.000000e+00 : f32
    %9 = vector.broadcast %cst_10 : f32 to vector<1x16x128xf32>
    %c9 = arith.constant 9 : index
    %c0_11 = arith.constant 0 : index
    %c0_12 = arith.constant 0 : index
    %10 = vector.load %arg14[%c9, %c0_11, %c0_12] : memref<10x16x128xf32, #tpu.memory_space<vmem>>, vector<1x16x128xf32>
    tpu.vector_store %arg14[%c9, %c0_11, %c0_12], %9 {strides = array<i32>} : memref<10x16x128xf32, #tpu.memory_space<vmem>>, vector<1x16x128xf32>,
    %cst_13 = arith.constant 0.000000e+00 : f32
    %11 = vector.broadcast %cst_13 : f32 to vector<10x1x128xf32>
    %c0_14 = arith.constant 0 : index
    %c0_15 = arith.constant 0 : index
    %c0_16 = arith.constant 0 : index
    %12 = vector.load %arg14[%c0_14, %c0_15, %c0_16] : memref<10x16x128xf32, #tpu.memory_space<vmem>>, vector<10x1x128xf32>
    tpu.vector_store %arg14[%c0_14, %c0_15, %c0_16], %11 {strides = array<i32>} : memref<10x16x128xf32, #tpu.memory_space<vmem>>, vector<10x1x128xf32>,
    %cst_17 = arith.constant 0.000000e+00 : f32
    %13 = vector.broadcast %cst_17 : f32 to vector<10x1x128xf32>
    %c0_18 = arith.constant 0 : index
    %c9_19 = arith.constant 9 : index
    %c0_20 = arith.constant 0 : index
    %14 = vector.load %arg14[%c0_18, %c9_19, %c0_20] : memref<10x16x128xf32, #tpu.memory_space<vmem>>, vector<10x1x128xf32>
    tpu.vector_store %arg14[%c0_18, %c9_19, %c0_20], %13 {strides = array<i32>} : memref<10x16x128xf32, #tpu.memory_space<vmem>>, vector<10x1x128xf32>,
    %cst_21 = arith.constant 0.000000e+00 : f32
    %15 = vector.broadcast %cst_21 : f32 to vector<64x128xf32>
    %16 = arith.maximumf %6, %15 : vector<64x128xf32>
    %17 = vector.shape_cast %16 : vector<64x128xf32> to vector<8x8x128xf32>
    %c1 = arith.constant 1 : index
    %c1_22 = arith.constant 1 : index
    %c0_23 = arith.constant 0 : index
    %18 = vector.load %arg14[%c1, %c1_22, %c0_23] : memref<10x16x128xf32, #tpu.memory_space<vmem>>, vector<8x8x128xf32>
    tpu.vector_store %arg14[%c1, %c1_22, %c0_23], %17 {strides = array<i32>} : memref<10x16x128xf32, #tpu.memory_space<vmem>>, vector<8x8x128xf32>,
    %c0_24 = arith.constant 0 : index
    %c0_25 = arith.constant 0 : index
    %19 = vector.load %arg5[%c0_24, %c0_25] : memref<1x128xf32, #tpu.memory_space<vmem>>, vector<1x128xf32>
    %c0_26 = arith.constant 0 : index
    %c0_27 = arith.constant 0 : index
    %c0_28 = arith.constant 0 : index
    %20 = vector.load %arg14[%c0_26, %c0_27, %c0_28] : memref<10x16x128xf32, #tpu.memory_space<vmem>>, vector<8x8x128xf32>
    %21 = vector.shape_cast %20 : vector<8x8x128xf32> to vector<64x128xf32>
    %c0_29 = arith.constant 0 : index
    %c0_30 = arith.constant 0 : index
    %22 = vector.load %arg13[%c0_29, %c0_30] : memref<64x384xf32, #tpu.memory_space<vmem>>, vector<64x128xf32>
    tpu.vector_store %arg13[%c0_29, %c0_30], %21 {strides = array<i32>} : memref<64x384xf32, #tpu.memory_space<vmem>>, vector<64x128xf32>,
    %c0_31 = arith.constant 0 : index
    %c1_32 = arith.constant 1 : index
    %c0_33 = arith.constant 0 : index
    %23 = vector.load %arg14[%c0_31, %c1_32, %c0_33] : memref<10x16x128xf32, #tpu.memory_space<vmem>>, vector<8x8x128xf32>
    %24 = vector.shape_cast %23 : vector<8x8x128xf32> to vector<64x128xf32>
    %c0_34 = arith.constant 0 : index
    %c128 = arith.constant 128 : index
    %25 = vector.load %arg13[%c0_34, %c128] : memref<64x384xf32, #tpu.memory_space<vmem>>, vector<64x128xf32>
    tpu.vector_store %arg13[%c0_34, %c128], %24 {strides = array<i32>} : memref<64x384xf32, #tpu.memory_space<vmem>>, vector<64x128xf32>,
    %c0_35 = arith.constant 0 : index
    %c2 = arith.constant 2 : index
    %c0_36 = arith.constant 0 : index
    %26 = vector.load %arg14[%c0_35, %c2, %c0_36] : memref<10x16x128xf32, #tpu.memory_space<vmem>>, vector<8x8x128xf32>
    %27 = vector.shape_cast %26 : vector<8x8x128xf32> to vector<64x128xf32>
    %c0_37 = arith.constant 0 : index
    %c256 = arith.constant 256 : index
    %28 = vector.load %arg13[%c0_37, %c256] : memref<64x384xf32, #tpu.memory_space<vmem>>, vector<64x128xf32>
    tpu.vector_store %arg13[%c0_37, %c256], %27 {strides = array<i32>} : memref<64x384xf32, #tpu.memory_space<vmem>>, vector<64x128xf32>,
    %c0_38 = arith.constant 0 : index
    %c0_39 = arith.constant 0 : index
    %29 = vector.load %arg13[%c0_38, %c0_39] : memref<64x384xf32, #tpu.memory_space<vmem>>, vector<64x384xf32>
    %c0_40 = arith.constant 0 : index
    %c0_41 = arith.constant 0 : index
    %30 = vector.load %arg4[%c0_40, %c0_41] : memref<1152x128xf32, #tpu.memory_space<vmem>>, vector<384x128xf32>
    %cst_42 = arith.constant dense<0.000000e+00> : vector<64x128xf32>
    %31 = tpu.matmul %29, %30, %cst_42 {dimension_numbers = #tpu.dot_dimension_numbers<[1], [0], [0], [1], [0, 0, 1, 1], [], []>} : vector<64x384xf32>, vector<384x128xf32>, vector<64x128xf32> -> vector<64x128xf32>
    %32 = vector.broadcast %19 : vector<1x128xf32> to vector<64x128xf32>
    %33 = arith.addf %32, %31 : vector<64x128xf32>
    %c1_43 = arith.constant 1 : index
    %c0_44 = arith.constant 0 : index
    %c0_45 = arith.constant 0 : index
    %34 = vector.load %arg14[%c1_43, %c0_44, %c0_45] : memref<10x16x128xf32, #tpu.memory_space<vmem>>, vector<8x8x128xf32>
    %35 = vector.shape_cast %34 : vector<8x8x128xf32> to vector<64x128xf32>
    %c0_46 = arith.constant 0 : index
    %c0_47 = arith.constant 0 : index
    %36 = vector.load %arg13[%c0_46, %c0_47] : memref<64x384xf32, #tpu.memory_space<vmem>>, vector<64x128xf32>
    tpu.vector_store %arg13[%c0_46, %c0_47], %35 {strides = array<i32>} : memref<64x384xf32, #tpu.memory_space<vmem>>, vector<64x128xf32>,
    %c1_48 = arith.constant 1 : index
    %c1_49 = arith.constant 1 : index
    %c0_50 = arith.constant 0 : index
    %37 = vector.load %arg14[%c1_48, %c1_49, %c0_50] : memref<10x16x128xf32, #tpu.memory_space<vmem>>, vector<8x8x128xf32>
    %38 = vector.shape_cast %37 : vector<8x8x128xf32> to vector<64x128xf32>
    %c0_51 = arith.constant 0 : index
    %c128_52 = arith.constant 128 : index
    %39 = vector.load %arg13[%c0_51, %c128_52] : memref<64x384xf32, #tpu.memory_space<vmem>>, vector<64x128xf32>
    tpu.vector_store %arg13[%c0_51, %c128_52], %38 {strides = array<i32>} : memref<64x384xf32, #tpu.memory_space<vmem>>, vector<64x128xf32>,
    %c1_53 = arith.constant 1 : index
    %c2_54 = arith.constant 2 : index
    %c0_55 = arith.constant 0 : index
    %40 = vector.load %arg14[%c1_53, %c2_54, %c0_55] : memref<10x16x128xf32, #tpu.memory_space<vmem>>, vector<8x8x128xf32>
    %41 = vector.shape_cast %40 : vector<8x8x128xf32> to vector<64x128xf32>
    %c0_56 = arith.constant 0 : index
    %c256_57 = arith.constant 256 : index
    %42 = vector.load %arg13[%c0_56, %c256_57] : memref<64x384xf32, #tpu.memory_space<vmem>>, vector<64x128xf32>
    tpu.vector_store %arg13[%c0_56, %c256_57], %41 {strides = array<i32>} : memref<64x384xf32, #tpu.memory_space<vmem>>, vector<64x128xf32>,
    %c0_58 = arith.constant 0 : index
    %c0_59 = arith.constant 0 : index
    %43 = vector.load %arg13[%c0_58, %c0_59] : memref<64x384xf32, #tpu.memory_space<vmem>>, vector<64x384xf32>
    %c384 = arith.constant 384 : index
    %c0_60 = arith.constant 0 : index
    %44 = vector.load %arg4[%c384, %c0_60] : memref<1152x128xf32, #tpu.memory_space<vmem>>, vector<384x128xf32>
    %cst_61 = arith.constant dense<0.000000e+00> : vector<64x128xf32>
    %45 = tpu.matmul %43, %44, %cst_61 {dimension_numbers = #tpu.dot_dimension_numbers<[1], [0], [0], [1], [0, 0, 1, 1], [], []>} : vector<64x384xf32>, vector<384x128xf32>, vector<64x128xf32> -> vector<64x128xf32>
    %46 = arith.addf %33, %45 : vector<64x128xf32>
    %c2_62 = arith.constant 2 : index
    %c0_63 = arith.constant 0 : index
    %c0_64 = arith.constant 0 : index
    %47 = vector.load %arg14[%c2_62, %c0_63, %c0_64] : memref<10x16x128xf32, #tpu.memory_space<vmem>>, vector<8x8x128xf32>
    %48 = vector.shape_cast %47 : vector<8x8x128xf32> to vector<64x128xf32>
    %c0_65 = arith.constant 0 : index
    %c0_66 = arith.constant 0 : index
    %49 = vector.load %arg13[%c0_65, %c0_66] : memref<64x384xf32, #tpu.memory_space<vmem>>, vector<64x128xf32>
    tpu.vector_store %arg13[%c0_65, %c0_66], %48 {strides = array<i32>} : memref<64x384xf32, #tpu.memory_space<vmem>>, vector<64x128xf32>,
    %c2_67 = arith.constant 2 : index
    %c1_68 = arith.constant 1 : index
    %c0_69 = arith.constant 0 : index
    %50 = vector.load %arg14[%c2_67, %c1_68, %c0_69] : memref<10x16x128xf32, #tpu.memory_space<vmem>>, vector<8x8x128xf32>
    %51 = vector.shape_cast %50 : vector<8x8x128xf32> to vector<64x128xf32>
    %c0_70 = arith.constant 0 : index
    %c128_71 = arith.constant 128 : index
    %52 = vector.load %arg13[%c0_70, %c128_71] : memref<64x384xf32, #tpu.memory_space<vmem>>, vector<64x128xf32>
    tpu.vector_store %arg13[%c0_70, %c128_71], %51 {strides = array<i32>} : memref<64x384xf32, #tpu.memory_space<vmem>>, vector<64x128xf32>,
    %c2_72 = arith.constant 2 : index
    %c2_73 = arith.constant 2 : index
    %c0_74 = arith.constant 0 : index
    %53 = vector.load %arg14[%c2_72, %c2_73, %c0_74] : memref<10x16x128xf32, #tpu.memory_space<vmem>>, vector<8x8x128xf32>
    %54 = vector.shape_cast %53 : vector<8x8x128xf32> to vector<64x128xf32>
    %c0_75 = arith.constant 0 : index
    %c256_76 = arith.constant 256 : index
    %55 = vector.load %arg13[%c0_75, %c256_76] : memref<64x384xf32, #tpu.memory_space<vmem>>, vector<64x128xf32>
    tpu.vector_store %arg13[%c0_75, %c256_76], %54 {strides = array<i32>} : memref<64x384xf32, #tpu.memory_space<vmem>>, vector<64x128xf32>,
    %c0_77 = arith.constant 0 : index
    %c0_78 = arith.constant 0 : index
    %56 = vector.load %arg13[%c0_77, %c0_78] : memref<64x384xf32, #tpu.memory_space<vmem>>, vector<64x384xf32>
    %c768 = arith.constant 768 : index
    %c0_79 = arith.constant 0 : index
    %57 = vector.load %arg4[%c768, %c0_79] : memref<1152x128xf32, #tpu.memory_space<vmem>>, vector<384x128xf32>
    %cst_80 = arith.constant dense<0.000000e+00> : vector<64x128xf32>
    %58 = tpu.matmul %56, %57, %cst_80 {dimension_numbers = #tpu.dot_dimension_numbers<[1], [0], [0], [1], [0, 0, 1, 1], [], []>} : vector<64x384xf32>, vector<384x128xf32>, vector<64x128xf32> -> vector<64x128xf32>
    %59 = arith.addf %46, %58 : vector<64x128xf32>
    %cst_81 = arith.constant 0.000000e+00 : f32
    %60 = vector.broadcast %cst_81 : f32 to vector<64x128xf32>
    %61 = arith.maximumf %59, %60 : vector<64x128xf32>
    %c0_82 = arith.constant 0 : index
    %c0_83 = arith.constant 0 : index
    %62 = vector.load %arg6[%c0_82, %c0_83] : memref<128x128xf32, #tpu.memory_space<vmem>>, vector<128x128xf32>
    %cst_84 = arith.constant dense<0.000000e+00> : vector<64x128xf32>
    %63 = tpu.matmul %61, %62, %cst_84 {dimension_numbers = #tpu.dot_dimension_numbers<[1], [0], [0], [1], [0, 0, 1, 1], [], []>} : vector<64x128xf32>, vector<128x128xf32>, vector<64x128xf32> -> vector<64x128xf32>
    %c0_85 = arith.constant 0 : index
    %c0_86 = arith.constant 0 : index
    %64 = vector.load %arg7[%c0_85, %c0_86] : memref<1x128xf32, #tpu.memory_space<vmem>>, vector<1x128xf32>
    %65 = vector.broadcast %64 : vector<1x128xf32> to vector<64x128xf32>
    %66 = arith.addf %63, %65 : vector<64x128xf32>
    %67 = arith.addf %6, %66 : vector<64x128xf32>
    %cst_87 = arith.constant 0.000000e+00 : f32
    %68 = vector.broadcast %cst_87 : f32 to vector<64x128xf32>
    %69 = arith.maximumf %67, %68 : vector<64x128xf32>
    %70 = vector.shape_cast %69 : vector<64x128xf32> to vector<8x8x128xf32>
    %c1_88 = arith.constant 1 : index
    %c1_89 = arith.constant 1 : index
    %c0_90 = arith.constant 0 : index
    %71 = vector.load %arg14[%c1_88, %c1_89, %c0_90] : memref<10x16x128xf32, #tpu.memory_space<vmem>>, vector<8x8x128xf32>
    tpu.vector_store %arg14[%c1_88, %c1_89, %c0_90], %70 {strides = array<i32>} : memref<10x16x128xf32, #tpu.memory_space<vmem>>, vector<8x8x128xf32>,
    %c0_91 = arith.constant 0 : index
    %c0_92 = arith.constant 0 : index
    %72 = vector.load %arg9[%c0_91, %c0_92] : memref<1x128xf32, #tpu.memory_space<vmem>>, vector<1x128xf32>
    %c0_93 = arith.constant 0 : index
    %c0_94 = arith.constant 0 : index
    %c0_95 = arith.constant 0 : index
    %73 = vector.load %arg14[%c0_93, %c0_94, %c0_95] : memref<10x16x128xf32, #tpu.memory_space<vmem>>, vector<8x8x128xf32>
    %74 = vector.shape_cast %73 : vector<8x8x128xf32> to vector<64x128xf32>
    %c0_96 = arith.constant 0 : index
    %c0_97 = arith.constant 0 : index
    %75 = vector.load %arg13[%c0_96, %c0_97] : memref<64x384xf32, #tpu.memory_space<vmem>>, vector<64x128xf32>
    tpu.vector_store %arg13[%c0_96, %c0_97], %74 {strides = array<i32>} : memref<64x384xf32, #tpu.memory_space<vmem>>, vector<64x128xf32>,
    %c0_98 = arith.constant 0 : index
    %c1_99 = arith.constant 1 : index
    %c0_100 = arith.constant 0 : index
    %76 = vector.load %arg14[%c0_98, %c1_99, %c0_100] : memref<10x16x128xf32, #tpu.memory_space<vmem>>, vector<8x8x128xf32>
    %77 = vector.shape_cast %76 : vector<8x8x128xf32> to vector<64x128xf32>
    %c0_101 = arith.constant 0 : index
    %c128_102 = arith.constant 128 : index
    %78 = vector.load %arg13[%c0_101, %c128_102] : memref<64x384xf32, #tpu.memory_space<vmem>>, vector<64x128xf32>
    tpu.vector_store %arg13[%c0_101, %c128_102], %77 {strides = array<i32>} : memref<64x384xf32, #tpu.memory_space<vmem>>, vector<64x128xf32>,
    %c0_103 = arith.constant 0 : index
    %c2_104 = arith.constant 2 : index
    %c0_105 = arith.constant 0 : index
    %79 = vector.load %arg14[%c0_103, %c2_104, %c0_105] : memref<10x16x128xf32, #tpu.memory_space<vmem>>, vector<8x8x128xf32>
    %80 = vector.shape_cast %79 : vector<8x8x128xf32> to vector<64x128xf32>
    %c0_106 = arith.constant 0 : index
    %c256_107 = arith.constant 256 : index
    %81 = vector.load %arg13[%c0_106, %c256_107] : memref<64x384xf32, #tpu.memory_space<vmem>>, vector<64x128xf32>
    tpu.vector_store %arg13[%c0_106, %c256_107], %80 {strides = array<i32>} : memref<64x384xf32, #tpu.memory_space<vmem>>, vector<64x128xf32>,
    %c0_108 = arith.constant 0 : index
    %c0_109 = arith.constant 0 : index
    %82 = vector.load %arg13[%c0_108, %c0_109] : memref<64x384xf32, #tpu.memory_space<vmem>>, vector<64x384xf32>
    %c0_110 = arith.constant 0 : index
    %c0_111 = arith.constant 0 : index
    %83 = vector.load %arg8[%c0_110, %c0_111] : memref<1152x128xf32, #tpu.memory_space<vmem>>, vector<384x128xf32>
    %cst_112 = arith.constant dense<0.000000e+00> : vector<64x128xf32>
    %84 = tpu.matmul %82, %83, %cst_112 {dimension_numbers = #tpu.dot_dimension_numbers<[1], [0], [0], [1], [0, 0, 1, 1], [], []>} : vector<64x384xf32>, vector<384x128xf32>, vector<64x128xf32> -> vector<64x128xf32>
    %85 = vector.broadcast %72 : vector<1x128xf32> to vector<64x128xf32>
    %86 = arith.addf %85, %84 : vector<64x128xf32>
    %c1_113 = arith.constant 1 : index
    %c0_114 = arith.constant 0 : index
    %c0_115 = arith.constant 0 : index
    %87 = vector.load %arg14[%c1_113, %c0_114, %c0_115] : memref<10x16x128xf32, #tpu.memory_space<vmem>>, vector<8x8x128xf32>
    %88 = vector.shape_cast %87 : vector<8x8x128xf32> to vector<64x128xf32>
    %c0_116 = arith.constant 0 : index
    %c0_117 = arith.constant 0 : index
    %89 = vector.load %arg13[%c0_116, %c0_117] : memref<64x384xf32, #tpu.memory_space<vmem>>, vector<64x128xf32>
    tpu.vector_store %arg13[%c0_116, %c0_117], %88 {strides = array<i32>} : memref<64x384xf32, #tpu.memory_space<vmem>>, vector<64x128xf32>,
    %c1_118 = arith.constant 1 : index
    %c1_119 = arith.constant 1 : index
    %c0_120 = arith.constant 0 : index
    %90 = vector.load %arg14[%c1_118, %c1_119, %c0_120] : memref<10x16x128xf32, #tpu.memory_space<vmem>>, vector<8x8x128xf32>
    %91 = vector.shape_cast %90 : vector<8x8x128xf32> to vector<64x128xf32>
    %c0_121 = arith.constant 0 : index
    %c128_122 = arith.constant 128 : index
    %92 = vector.load %arg13[%c0_121, %c128_122] : memref<64x384xf32, #tpu.memory_space<vmem>>, vector<64x128xf32>
    tpu.vector_store %arg13[%c0_121, %c128_122], %91 {strides = array<i32>} : memref<64x384xf32, #tpu.memory_space<vmem>>, vector<64x128xf32>,
    %c1_123 = arith.constant 1 : index
    %c2_124 = arith.constant 2 : index
    %c0_125 = arith.constant 0 : index
    %93 = vector.load %arg14[%c1_123, %c2_124, %c0_125] : memref<10x16x128xf32, #tpu.memory_space<vmem>>, vector<8x8x128xf32>
    %94 = vector.shape_cast %93 : vector<8x8x128xf32> to vector<64x128xf32>
    %c0_126 = arith.constant 0 : index
    %c256_127 = arith.constant 256 : index
    %95 = vector.load %arg13[%c0_126, %c256_127] : memref<64x384xf32, #tpu.memory_space<vmem>>, vector<64x128xf32>
    tpu.vector_store %arg13[%c0_126, %c256_127], %94 {strides = array<i32>} : memref<64x384xf32, #tpu.memory_space<vmem>>, vector<64x128xf32>,
    %c0_128 = arith.constant 0 : index
    %c0_129 = arith.constant 0 : index
    %96 = vector.load %arg13[%c0_128, %c0_129] : memref<64x384xf32, #tpu.memory_space<vmem>>, vector<64x384xf32>
    %c384_130 = arith.constant 384 : index
    %c0_131 = arith.constant 0 : index
    %97 = vector.load %arg8[%c384_130, %c0_131] : memref<1152x128xf32, #tpu.memory_space<vmem>>, vector<384x128xf32>
    %cst_132 = arith.constant dense<0.000000e+00> : vector<64x128xf32>
    %98 = tpu.matmul %96, %97, %cst_132 {dimension_numbers = #tpu.dot_dimension_numbers<[1], [0], [0], [1], [0, 0, 1, 1], [], []>} : vector<64x384xf32>, vector<384x128xf32>, vector<64x128xf32> -> vector<64x128xf32>
    %99 = arith.addf %86, %98 : vector<64x128xf32>
    %c2_133 = arith.constant 2 : index
    %c0_134 = arith.constant 0 : index
    %c0_135 = arith.constant 0 : index
    %100 = vector.load %arg14[%c2_133, %c0_134, %c0_135] : memref<10x16x128xf32, #tpu.memory_space<vmem>>, vector<8x8x128xf32>
    %101 = vector.shape_cast %100 : vector<8x8x128xf32> to vector<64x128xf32>
    %c0_136 = arith.constant 0 : index
    %c0_137 = arith.constant 0 : index
    %102 = vector.load %arg13[%c0_136, %c0_137] : memref<64x384xf32, #tpu.memory_space<vmem>>, vector<64x128xf32>
    tpu.vector_store %arg13[%c0_136, %c0_137], %101 {strides = array<i32>} : memref<64x384xf32, #tpu.memory_space<vmem>>, vector<64x128xf32>,
    %c2_138 = arith.constant 2 : index
    %c1_139 = arith.constant 1 : index
    %c0_140 = arith.constant 0 : index
    %103 = vector.load %arg14[%c2_138, %c1_139, %c0_140] : memref<10x16x128xf32, #tpu.memory_space<vmem>>, vector<8x8x128xf32>
    %104 = vector.shape_cast %103 : vector<8x8x128xf32> to vector<64x128xf32>
    %c0_141 = arith.constant 0 : index
    %c128_142 = arith.constant 128 : index
    %105 = vector.load %arg13[%c0_141, %c128_142] : memref<64x384xf32, #tpu.memory_space<vmem>>, vector<64x128xf32>
    tpu.vector_store %arg13[%c0_141, %c128_142], %104 {strides = array<i32>} : memref<64x384xf32, #tpu.memory_space<vmem>>, vector<64x128xf32>,
    %c2_143 = arith.constant 2 : index
    %c2_144 = arith.constant 2 : index
    %c0_145 = arith.constant 0 : index
    %106 = vector.load %arg14[%c2_143, %c2_144, %c0_145] : memref<10x16x128xf32, #tpu.memory_space<vmem>>, vector<8x8x128xf32>
    %107 = vector.shape_cast %106 : vector<8x8x128xf32> to vector<64x128xf32>
    %c0_146 = arith.constant 0 : index
    %c256_147 = arith.constant 256 : index
    %108 = vector.load %arg13[%c0_146, %c256_147] : memref<64x384xf32, #tpu.memory_space<vmem>>, vector<64x128xf32>
    tpu.vector_store %arg13[%c0_146, %c256_147], %107 {strides = array<i32>} : memref<64x384xf32, #tpu.memory_space<vmem>>, vector<64x128xf32>,
    %c0_148 = arith.constant 0 : index
    %c0_149 = arith.constant 0 : index
    %109 = vector.load %arg13[%c0_148, %c0_149] : memref<64x384xf32, #tpu.memory_space<vmem>>, vector<64x384xf32>
    %c768_150 = arith.constant 768 : index
    %c0_151 = arith.constant 0 : index
    %110 = vector.load %arg8[%c768_150, %c0_151] : memref<1152x128xf32, #tpu.memory_space<vmem>>, vector<384x128xf32>
    %cst_152 = arith.constant dense<0.000000e+00> : vector<64x128xf32>
    %111 = tpu.matmul %109, %110, %cst_152 {dimension_numbers = #tpu.dot_dimension_numbers<[1], [0], [0], [1], [0, 0, 1, 1], [], []>} : vector<64x384xf32>, vector<384x128xf32>, vector<64x128xf32> -> vector<64x128xf32>
    %112 = arith.addf %99, %111 : vector<64x128xf32>
    %cst_153 = arith.constant 0.000000e+00 : f32
    %113 = vector.broadcast %cst_153 : f32 to vector<64x128xf32>
    %114 = arith.maximumf %112, %113 : vector<64x128xf32>
    %c0_154 = arith.constant 0 : index
    %c0_155 = arith.constant 0 : index
    %115 = vector.load %arg10[%c0_154, %c0_155] : memref<128x128xf32, #tpu.memory_space<vmem>>, vector<128x128xf32>
    %cst_156 = arith.constant dense<0.000000e+00> : vector<64x128xf32>
    %116 = tpu.matmul %114, %115, %cst_156 {dimension_numbers = #tpu.dot_dimension_numbers<[1], [0], [0], [1], [0, 0, 1, 1], [], []>} : vector<64x128xf32>, vector<128x128xf32>, vector<64x128xf32> -> vector<64x128xf32>
    %c0_157 = arith.constant 0 : index
    %c0_158 = arith.constant 0 : index
    %117 = vector.load %arg11[%c0_157, %c0_158] : memref<1x128xf32, #tpu.memory_space<vmem>>, vector<1x128xf32>
    %118 = vector.broadcast %117 : vector<1x128xf32> to vector<64x128xf32>
    %119 = arith.addf %116, %118 : vector<64x128xf32>
    %120 = arith.addf %67, %119 : vector<64x128xf32>
    %c0_159 = arith.constant 0 : index
    %c0_160 = arith.constant 0 : index
    %c0_161 = arith.constant 0 : index
    %121 = vector.load %arg12[%c0_159, %c0_160, %c0_161] : memref<1x64x128xf32, #tpu.memory_space<vmem>>, vector<1x64x128xf32>
    %122 = vector.shape_cast %121 : vector<1x64x128xf32> to vector<64x128xf32>
    %123 = vector.shape_cast %120 : vector<64x128xf32> to vector<1x64x128xf32>
    tpu.vector_store %arg12[%c0_159, %c0_160, %c0_161], %123 {strides = array<i32>} : memref<1x64x128xf32, #tpu.memory_space<vmem>>, vector<1x64x128xf32>,
    return
  }
  func.func @transform_0(%arg0: i32) -> (i32, i32, i32) {
    %c0_i32 = arith.constant 0 : i32
    %c0_i32_0 = arith.constant 0 : i32
    %c0_i32_1 = arith.constant 0 : i32
    return %arg0, %c0_i32, %c0_i32_0 : i32, i32, i32
  }
  func.func @transform_1(%arg0: i32) -> (i32, i32) {
    %c0_i32 = arith.constant 0 : i32
    %c0_i32_0 = arith.constant 0 : i32
    %c0_i32_1 = arith.constant 0 : i32
    return %c0_i32, %c0_i32_0 : i32, i32
  }
  func.func @transform_2(%arg0: i32) -> (i32, i32) {
    %c0_i32 = arith.constant 0 : i32
    %c0_i32_0 = arith.constant 0 : i32
    %c0_i32_1 = arith.constant 0 : i32
    return %c0_i32, %c0_i32_0 : i32, i32
  }
  func.func @transform_3(%arg0: i32) -> (i32, i32) {
    %c0_i32 = arith.constant 0 : i32
    %c0_i32_0 = arith.constant 0 : i32
    %c0_i32_1 = arith.constant 0 : i32
    return %c0_i32, %c0_i32_0 : i32, i32
  }
  func.func @transform_4(%arg0: i32) -> (i32, i32) {
    %c0_i32 = arith.constant 0 : i32
    %c0_i32_0 = arith.constant 0 : i32
    %c0_i32_1 = arith.constant 0 : i32
    return %c0_i32, %c0_i32_0 : i32, i32
  }
  func.func @transform_5(%arg0: i32) -> (i32, i32) {
    %c0_i32 = arith.constant 0 : i32
    %c0_i32_0 = arith.constant 0 : i32
    %c0_i32_1 = arith.constant 0 : i32
    return %c0_i32, %c0_i32_0 : i32, i32
  }
  func.func @transform_6(%arg0: i32) -> (i32, i32) {
    %c0_i32 = arith.constant 0 : i32
    %c0_i32_0 = arith.constant 0 : i32
    %c0_i32_1 = arith.constant 0 : i32
    return %c0_i32, %c0_i32_0 : i32, i32
  }
  func.func @transform_7(%arg0: i32) -> (i32, i32) {
    %c0_i32 = arith.constant 0 : i32
    %c0_i32_0 = arith.constant 0 : i32
    %c0_i32_1 = arith.constant 0 : i32
    return %c0_i32, %c0_i32_0 : i32, i32
  }
  func.func @transform_8(%arg0: i32) -> (i32, i32) {
    %c0_i32 = arith.constant 0 : i32
    %c0_i32_0 = arith.constant 0 : i32
    %c0_i32_1 = arith.constant 0 : i32
    return %c0_i32, %c0_i32_0 : i32, i32
  }
  func.func @transform_9(%arg0: i32) -> (i32, i32) {
    %c0_i32 = arith.constant 0 : i32
    %c0_i32_0 = arith.constant 0 : i32
    %c0_i32_1 = arith.constant 0 : i32
    return %c0_i32, %c0_i32_0 : i32, i32
  }
  func.func @transform_10(%arg0: i32) -> (i32, i32) {
    %c0_i32 = arith.constant 0 : i32
    %c0_i32_0 = arith.constant 0 : i32
    %c0_i32_1 = arith.constant 0 : i32
    return %c0_i32, %c0_i32_0 : i32, i32
  }
  func.func @transform_11(%arg0: i32) -> (i32, i32, i32) {
    %c0_i32 = arith.constant 0 : i32
    %c0_i32_0 = arith.constant 0 : i32
    %c0_i32_1 = arith.constant 0 : i32
    return %arg0, %c0_i32, %c0_i32_0 : i32, i32, i32
  }
}

</mosaic_0001>

<bundles_post_ra>
// kernel: half_encoder_forward.1
= control target key start
LH: loop header
LB: loop body
LE: loop exit
PB: predicated region body
PF: predicated region fallthrough
CT: control target
= control target key end

     0   :  { %s4611_s17 = smov 0   ;;  %s6004_s0 = inlined_call_operand.vmem [shape: f32[2,64,128], index: 0, kind: input, shape index: {}]   ;;  %s6005_s1 = inlined_call_operand.vmem [shape: f32[128,128], index: 1, kind: input, shape index: {}]   ;;  %s6006_s2 = inlined_call_operand.vmem [shape: f32[1,128], index: 2, kind: input, shape index: {}]   ;;  %s6007_s3 = inlined_call_operand.vmem [shape: f32[1152,128], index: 3, kind: input, shape index: {}]   ;;  %s6008_s4 = inlined_call_operand.vmem [shape: f32[1,128], index: 4, kind: input, shape index: {}]   ;;  %s6009_s5 = inlined_call_operand.vmem [shape: f32[128,128], index: 5, kind: input, shape index: {}]   ;;  %s6010_s6 = inlined_call_operand.vmem [shape: f32[1,128], index: 6, kind: input, shape index: {}]   ;;  %s6011_s7 = inlined_call_operand.vmem [shape: f32[1152,128], index: 7, kind: input, shape index: {}]   ;;  %s6012_s8 = inlined_call_operand.vmem [shape: f32[1,128], index: 8, kind: input, shape index: {}]   ;;  %s6013_s9 = inlined_call_operand.vmem [shape: f32[128,128], index: 9, kind: input, shape index: {}]   ;;  %s6014_s10 = inlined_call_operand.vmem [shape: f32[1,128], index: 10, kind: input, shape index: {}]   ;;  %s6015_s11 = inlined_call_operand.vmem [shape: f32[2,64,128], index: 11, kind: output, shape index: {}]  }
   0x1 LB: > { %s2975_s18 = sadd.s32 4294967295, %s4548_s17   ;;  %p2979_p0 = scmp.ge.s32.totalorder %s4548_s17, 1  ;;  %s4548_s17 = sphi %s4611_s17, %s21_s17  }
   0x2   : > { %p337_p1 = scmp.lt.s32.totalorder %s4548_s17, 3 }
   0x4   : > { %p338_p2 = pnand %p2979_p0, %p337_p1 }
   0x5   : > { %v395_v0 = vld [vmem:[%s6005_s1] sm:$0xff] (!%p338_p2)  ;;  %v396_v1 = vld [vmem:[%s6005_s1 + $0x8] sm:$0xff] (!%p338_p2)  ;;  %v397_v2 = vld [vmem:[%s6005_s1 + $0x10] sm:$0xff] (!%p338_p2)  ;;  %p377_p3 = scmp.lt.s32.totalorder (!%p338_p2), %s2975_s18, 1 }
   0x6   : > { %341 = sbr.rel (%p338_p2) target bundleno = 1308 (0x51c), region = 64  ;;  %v3941_v3 = vpack.c.bf16 (!%p338_p2), %v396_v1, %v395_v0  ;;  %v398_v4 = vld [vmem:[%s6005_s1 + $0x18] sm:$0xff] (!%p338_p2)  ;;  %v399_v6 = vld [vmem:[%s6005_s1 + $0x20] sm:$0xff] (!%p338_p2)  ;;  %v400_v7 = vld [vmem:[%s6005_s1 + $0x28] sm:$0xff] (!%p338_p2) }
   0x7   : > { %v3945_v5 = vpack.c.bf16 (!%p338_p2), %v398_v4, %v397_v2  ;;  %v3949_v8 = vpack.c.bf16 (!%p338_p2), %v400_v7, %v399_v6  ;;  %v654_v9 = vld [vmem:[%s6007_s3 + $0x80] sm:$0xff] (!%p338_p2)  ;;  %v655_v10 = vld [vmem:[%s6007_s3 + $0x88] sm:$0xff] (!%p338_p2)  ;;  %v401_v11 = vld [vmem:[%s6005_s1 + $0x30] sm:$0xff] (!%p338_p2) }
   0x8   : > { %3942 = vmatprep.subr.bf16.mxu0 (!%p338_p2), %v3941_v3  ;;  %v402_v12 = vld [vmem:[%s6005_s1 + $0x38] sm:$0xff] (!%p338_p2)  ;;  %v3973_v14 = vpack.c.bf16 (!%p338_p2), %v655_v10, %v654_v9  ;;  %v638_v15 = vld [vmem:[%s6007_s3] sm:$0xff] (!%p338_p2)  ;;  %v404_v18 = vld [vmem:[%s6005_s1 + $0x48] sm:$0xff] (!%p338_p2) }
   0x9   : > { %3944 = vmatpush3.bf16.msra.mxu0 (!%p338_p2), %v3941_v3  ;;  %v3953_v16 = vpack.c.bf16 (!%p338_p2), %v402_v12, %v401_v11  ;;  %v403_v17 = vld [vmem:[%s6005_s1 + $0x40] sm:$0xff] (!%p338_p2)  ;;  %v639_v19 = vld [vmem:[%s6007_s3 + $0x8] sm:$0xff] (!%p338_p2)  ;;  %v656_v21 = vld [vmem:[%s6007_s3 + $0x90] sm:$0xff] (!%p338_p2) }
   0xa   : > { %3946 = vmatprep.subr.bf16.mxu0 (!%p338_p2), %v3945_v5  ;;  %3974 = vmatprep.subr.bf16.mxu1 (!%p338_p2), %v3973_v14  ;;  %v3975_v20 = vpack.c.bf16 (!%p338_p2), %v639_v19, %v638_v15  ;;  %v657_v22 = vld [vmem:[%s6007_s3 + $0x98] sm:$0xff] (!%p338_p2)  ;;  %v640_v23 = vld [vmem:[%s6007_s3 + $0x10] sm:$0xff] (!%p338_p2)  ;;  %v658_v27 = vld [vmem:[%s6007_s3 + $0xa0] sm:$0xff] (!%p338_p2)  ;;  %v3957_v29 = vpack.c.bf16 (!%p338_p2), %v404_v18, %v403_v17 }
   0xb   : > { %v3977_v24 = vpack.c.bf16 (!%p338_p2), %v657_v22, %v656_v21  ;;  %v641_v25 = vld [vmem:[%s6007_s3 + $0x18] sm:$0xff] (!%p338_p2)  ;;  %v659_v28 = vld [vmem:[%s6007_s3 + $0xa8] sm:$0xff] (!%p338_p2)  ;;  %v405_v30 = vld [vmem:[%s6005_s1 + $0x50] sm:$0xff] (!%p338_p2) }
   0xc   : > { %3976 = vmatpush3.bf16.msra.mxu1 (!%p338_p2), %v3975_v20  ;;  %v3979_v26 = vpack.c.bf16 (!%p338_p2), %v641_v25, %v640_v23  ;;  %v3981_v31 = vpack.c.bf16 (!%p338_p2), %v659_v28, %v658_v27  ;;  %v642_v32 = vld [vmem:[%s6007_s3 + $0x20] sm:$0xff] (!%p338_p2)  ;;  %v643_v33 = vld [vmem:[%s6007_s3 + $0x28] sm:$0xff] (!%p338_p2)  ;;  %v406_v34 = vld [vmem:[%s6005_s1 + $0x58] sm:$0xff] (!%p338_p2)  ;;  %v4550_v25 = vmov (!%p338_p2), 0.0  }
   0xd   : > { %s6017_s18 = smov (!%p377_p3, %s2975_s18), 1  ;;  %3948 = vmatpush3.bf16.msra.mxu0 %v3945_v5  ;;  %3978 = vmatprep.subr.bf16.mxu1 %v3977_v24  ;;  %v660_v35 = vld [vmem:[%s6007_s3 + $0xb0] sm:$0xff]  ;;  %v661_v36 = vld [vmem:[%s6007_s3 + $0xb8] sm:$0xff]  ;;  %v3983_v37 = vpack.c.bf16 %v643_v33, %v642_v32  ;;  %v3961_v38 = vpack.c.bf16 %v406_v34, %v405_v30  ;;  %v407_v39 = vld [vmem:[%s6005_s1 + $0x60] sm:$0xff]  ;;  %523 = vst [vmem:[#allocation3] sm:$0xff] %v4550_v25 }
   0xe   : > { %s2991_s12 = sshll.u32 %s6017_s18, 6  ;;  %3950 = vmatprep.subr.bf16.mxu0 %v3949_v8  ;;  %v3985_v40 = vpack.c.bf16 %v661_v36, %v660_v35  ;;  %v644_v41 = vld [vmem:[%s6007_s3 + $0x30] sm:$0xff]  ;;  %v645_v42 = vld [vmem:[%s6007_s3 + $0x38] sm:$0xff]  ;;  %v408_v43 = vld [vmem:[%s6005_s1 + $0x68] sm:$0xff]  ;;  %524 = vst [vmem:[#allocation3 + $0x8] sm:$0xff] %v4550_v25 }
   0xf   : > { %s4645_s15 = scalar_lea.vmem %s6004_s0, %s2991_s12  ;;  %v662_v44 = vld [vmem:[%s6007_s3 + $0xc0] sm:$0xff]  ;;  %v663_v45 = vld [vmem:[%s6007_s3 + $0xc8] sm:$0xff]  ;;  %v3987_v46 = vpack.c.bf16 %v645_v42, %v644_v41  ;;  %v3965_v47 = vpack.c.bf16 %v408_v43, %v407_v39  ;;  %v409_v48 = vld [vmem:[%s6005_s1 + $0x70] sm:$0xff]  ;;  %526 = vst [vmem:[#allocation3 + $0x90] sm:$0xff] %v4550_v25  ;;  %s386_s23 = scalar_lea.vmem %s6015_s11, %s2991_s12 }
  0x10   : > { %v387_v13 = vld [vmem:[%s4645_s15] sm:$0xff]  ;;  %3980 = vmatpush3.bf16.msra.mxu1 %v3979_v26  ;;  %v3989_v49 = vpack.c.bf16 %v663_v45, %v662_v44  ;;  %v647_v51 = vld [vmem:[%s6007_s3 + $0x48] sm:$0xff]  ;;  %v410_v52 = vld [vmem:[%s6005_s1 + $0x78] sm:$0xff]  ;;  %527 = vst [vmem:[#allocation3 + $0x98] sm:$0xff] %v4550_v25 }
  0x11   : > { %3577 = vmatprep.mubr.f32.mxu0 %v387_v13  ;;  %3952 = vmatpush3.bf16.msra.mxu0 %v3949_v8  ;;  %v646_v50 = vld [vmem:[%s6007_s3 + $0x40] sm:$0xff]  ;;  %v664_v53 = vld [vmem:[%s6007_s3 + $0xd0] sm:$0xff]  ;;  %v665_v54 = vld [vmem:[%s6007_s3 + $0xd8] sm:$0xff]  ;;  %v3969_v56 = vpack.c.bf16 %v410_v52, %v409_v48  ;;  %529 = vst [vmem:[#allocation3 + $0x10] sm:$0x1] %v4550_v25 }
  0x12   : > { %3954 = vmatprep.subr.bf16.mxu0 %v3953_v16  ;;  %3982 = vmatprep.subr.bf16.mxu1 %v3981_v31  ;;  %v3991_v55 = vpack.c.bf16 %v647_v51, %v646_v50  ;;  %v3993_v57 = vpack.c.bf16 %v665_v54, %v664_v53  ;;  %v648_v58 = vld [vmem:[%s6007_s3 + $0x50] sm:$0xff]  ;;  %v649_v59 = vld [vmem:[%s6007_s3 + $0x58] sm:$0xff]  ;;  %v670_v60 = vld [vmem:[%s6007_s3 + $0x100] sm:$0xff]  ;;  %530 = vst [vmem:[#allocation3 + $0x20] sm:$0x1] %v4550_v25 }
  0x13   : > { %v671_v61 = vld [vmem:[%s6007_s3 + $0x108] sm:$0xff]  ;;  %v3995_v62 = vpack.c.bf16 %v649_v59, %v648_v58  ;;  %v672_v0 = vld [vmem:[%s6007_s3 + $0x110] sm:$0xff]  ;;  %v673_v1 = vld [vmem:[%s6007_s3 + $0x118] sm:$0xff]  ;;  %531 = vst [vmem:[#allocation3 + $0x30] sm:$0x1] %v4550_v25 }
  0x14   : > { %3984 = vmatpush3.bf16.msra.mxu1 %v3983_v37  ;;  %v4005_v63 = vpack.c.bf16 %v671_v61, %v670_v60  ;;  %v388_v2 = vld [vmem:[%s4645_s15 + $0x8] sm:$0xff]  ;;  %v389_v3 = vld [vmem:[%s4645_s15 + $0x10] sm:$0xff]  ;;  %v4009_v4 = vpack.c.bf16 %v673_v1, %v672_v0  ;;  %v674_v5 = vld [vmem:[%s6007_s3 + $0x120] sm:$0xff]  ;;  %532 = vst [vmem:[#allocation3 + $0x40] sm:$0x1] %v4550_v25 }
  0x15   : > { %3956 = vmatpush3.bf16.msra.mxu0 %v3953_v16  ;;  %3986 = vmatprep.subr.bf16.mxu1 %v3985_v40  ;;  %v675_v6 = vld [vmem:[%s6007_s3 + $0x128] sm:$0xff]  ;;  %v390_v7 = vld [vmem:[%s4645_s15 + $0x18] sm:$0xff]  ;;  %v391_v8 = vld [vmem:[%s4645_s15 + $0x20] sm:$0xff]  ;;  %533 = vst [vmem:[#allocation3 + $0x50] sm:$0x1] %v4550_v25 }
  0x16   : > { %3958 = vmatprep.subr.bf16.mxu0 %v3957_v29  ;;  %v4013_v9 = vpack.c.bf16 %v675_v6, %v674_v5  ;;  %v676_v10 = vld [vmem:[%s6007_s3 + $0x130] sm:$0xff]  ;;  %v677_v11 = vld [vmem:[%s6007_s3 + $0x138] sm:$0xff]  ;;  %v392_v12 = vld [vmem:[%s4645_s15 + $0x28] sm:$0xff]  ;;  %534 = vst [vmem:[#allocation3 + $0x60] sm:$0x1] %v4550_v25 }
  0x17   : > { %v393_v13 = vld [vmem:[%s4645_s15 + $0x30] sm:$0xff]  ;;  %v4017_v14 = vpack.c.bf16 %v677_v11, %v676_v10  ;;  %v678_v15 = vld [vmem:[%s6007_s3 + $0x140] sm:$0xff]  ;;  %v679_v16 = vld [vmem:[%s6007_s3 + $0x148] sm:$0xff]  ;;  %535 = vst [vmem:[#allocation3 + $0x70] sm:$0x1] %v4550_v25 }
  0x18   : > { %3988 = vmatpush3.bf16.msra.mxu1 %v3987_v46  ;;  %v394_v17 = vld [vmem:[%s4645_s15 + $0x38] sm:$0xff]  ;;  %v4021_v18 = vpack.c.bf16 %v679_v16, %v678_v15  ;;  %v666_v19 = vld [vmem:[%s6007_s3 + $0xe0] sm:$0xff]  ;;  %v667_v20 = vld [vmem:[%s6007_s3 + $0xe8] sm:$0xff]  ;;  %536 = vst [vmem:[#allocation3 + $0x80] sm:$0x1] %v4550_v25 }
  0x19   : > { %3960 = vmatpush3.bf16.msra.mxu0 %v3957_v29  ;;  %3990 = vmatprep.subr.bf16.mxu1 %v3989_v49  ;;  %v3997_v21 = vpack.c.bf16 %v667_v20, %v666_v19  ;;  %v650_v22 = vld [vmem:[%s6007_s3 + $0x60] sm:$0xff]  ;;  %v651_v23 = vld [vmem:[%s6007_s3 + $0x68] sm:$0xff]  ;;  %539 = vst [vmem:[#allocation3 + $0x19] sm:$0x1] %v4550_v25  ;;  %540 = vst [vmem:[#allocation3 + $0x29] sm:$0x1] %v4550_v25 }
  0x1a   : > { %3962 = vmatprep.subr.bf16.mxu0 %v3961_v38  ;;  %v3999_v24 = vpack.c.bf16 %v651_v23, %v650_v22  ;;  %541 = vst [vmem:[#allocation3 + $0x39] sm:$0x1] %v4550_v25  ;;  %542 = vst [vmem:[#allocation3 + $0x49] sm:$0x1] %v4550_v25  ;;  %v680_v26 = vld [vmem:[%s6007_s3 + $0x150] sm:$0xff]  ;;  %v681_v27 = vld [vmem:[%s6007_s3 + $0x158] sm:$0xff] }
  0x1b   : > { %543 = vst [vmem:[#allocation3 + $0x59] sm:$0x1] %v4550_v25  ;;  %544 = vst [vmem:[#allocation3 + $0x69] sm:$0x1] %v4550_v25  ;;  %v668_v28 = vld [vmem:[%s6007_s3 + $0xf0] sm:$0xff]  ;;  %v4025_v29 = vpack.c.bf16 %v681_v27, %v680_v26  ;;  %v669_v30 = vld [vmem:[%s6007_s3 + $0xf8] sm:$0xff] }
  0x1c   : > { %3992 = vmatpush3.bf16.msra.mxu1 %v3991_v55  ;;  %545 = vst [vmem:[#allocation3 + $0x79] sm:$0x1] %v4550_v25  ;;  %546 = vst [vmem:[#allocation3 + $0x89] sm:$0x1] %v4550_v25  ;;  %v652_v31 = vld [vmem:[%s6007_s3 + $0x70] sm:$0xff]  ;;  %v653_v32 = vld [vmem:[%s6007_s3 + $0x78] sm:$0xff]  ;;  %v4001_v33 = vpack.c.bf16 %v669_v30, %v668_v28 }
  0x1d   : > { %3964 = vmatpush3.bf16.msra.mxu0 %v3961_v38  ;;  %3994 = vmatprep.subr.bf16.mxu1 %v3993_v57  ;;  %528 = vst [vmem:[#allocation3] sm:$0x1] %v4550_v25  ;;  %538 = vst [vmem:[#allocation3 + $0x9] sm:$0x1] %v4550_v25  ;;  %v4003_v34 = vpack.c.bf16 %v653_v32, %v652_v31  ;;  %v682_v35 = vld [vmem:[%s6007_s3 + $0x160] sm:$0xff]  ;;  %v683_v36 = vld [vmem:[%s6007_s3 + $0x168] sm:$0xff] }
  0x1e   : > { %3966 = vmatprep.subr.bf16.mxu0 %v3965_v47  ;;  %537 = vst [vmem:[#allocation3 + $0x90] sm:$0x1] %v4550_v25  ;;  %547 = vst [vmem:[#allocation3 + $0x99] sm:$0x1] %v4550_v25  ;;  %v4029_v37 = vpack.c.bf16 %v683_v36, %v682_v35  ;;  %v582_v38 = vld [vmem:[#allocation3 + $0x1] sm:$0xff]  ;;  %v684_v40 = vld [vmem:[%s6007_s3 + $0x170] sm:$0xff] }
  0x1f   : > { %750 = vmatprep.mubr.f32.mxu1 %v582_v38  ;;  %v685_v41 = vld [vmem:[%s6007_s3 + $0x178] sm:$0xff]  ;;  %v998_v43 = vld [vmem:[%s6007_s3 + $0x200] sm:$0xff]  ;;  %v999_v44 = vld [vmem:[%s6007_s3 + $0x208] sm:$0xff] }
  0x20   : > { %3996 = vmatpush3.bf16.msra.mxu1 %v3995_v62  ;;  %v4033_v42 = vpack.c.bf16 %v685_v41, %v684_v40  ;;  %v4037_v45 = vpack.c.bf16 %v999_v44, %v998_v43  ;;  %v982_v46 = vld [vmem:[%s6007_s3 + $0x180] sm:$0xff]  ;;  %v1015_v50 = vld [vmem:[%s6007_s3 + $0x288] sm:$0xff]  ;;  %v1000_v52 = vld [vmem:[%s6007_s3 + $0x210] sm:$0xff] }
  0x21   : > { %3968 = vmatpush3.bf16.msra.mxu0 %v3965_v47  ;;  %3998 = vmatprep.subr.bf16.mxu1 %v3997_v21  ;;  %v983_v47 = vld [vmem:[%s6007_s3 + $0x188] sm:$0xff]  ;;  %v1014_v49 = vld [vmem:[%s6007_s3 + $0x280] sm:$0xff]  ;;  %v1001_v53 = vld [vmem:[%s6007_s3 + $0x218] sm:$0xff] }
  0x22   : > { %3970 = vmatprep.subr.bf16.mxu0 %v3969_v56  ;;  %v4039_v48 = vpack.c.bf16 %v983_v47, %v982_v46  ;;  %v4847_v51 = vpack.c.bf16 %v1015_v50, %v1014_v49  ;;  %v4041_v55 = vpack.c.bf16 %v1001_v53, %v1000_v52  ;;  %v985_v57 = vld [vmem:[%s6007_s3 + $0x198] sm:$0xff]  ;;  %v1002_v59 = vld [vmem:[%s6007_s3 + $0x220] sm:$0xff]  ;;  %v1003_v60 = vld [vmem:[%s6007_s3 + $0x228] sm:$0xff] }
  0x23   : > { %v4045_v61 = vpack.c.bf16 %v1003_v60, %v1002_v59  ;;  %v986_v62 = vld [vmem:[%s6007_s3 + $0x1a0] sm:$0xff]  ;;  %v1004_v1 = vld [vmem:[%s6007_s3 + $0x230] sm:$0xff]  ;;  %v989_v5 = vld [vmem:[%s6007_s3 + $0x1b8] sm:$0xff] }
  0x24   : > { %4000 = vmatpush3.bf16.msra.mxu1 %v3999_v24  ;;  %v566_v39 = vld [vmem:[#allocation3] sm:$0xff]  ;;  %v991_v11 = vld [vmem:[%s6007_s3 + $0x1c8] sm:$0xff]  ;;  %v992_v16 = vld [vmem:[%s6007_s3 + $0x1d0] sm:$0xff] }
  0x25   : > { %3972 = vmatpush3.bf16.msra.mxu0 %v3969_v56  ;;  %4002 = vmatprep.subr.bf16.mxu1 %v4001_v33  ;;  %v598_v54 = vld [vmem:[#allocation3 + $0x2] sm:$0xff]  ;;  %v984_v56 = vld [vmem:[%s6007_s3 + $0x190] sm:$0xff]  ;;  %v1013_v26 = vld [vmem:[%s6007_s3 + $0x278] sm:$0xff] }
  0x26   : > { %4006 = vmatprep.subr.bf16.mxu0 %v4005_v63  ;;  %v4043_v58 = vpack.c.bf16 %v985_v57, %v984_v56  ;;  %v990_v10 = vld [vmem:[%s6007_s3 + $0x1c0] sm:$0xff]  ;;  %v1011_v20 = vld [vmem:[%s6007_s3 + $0x268] sm:$0xff]  ;;  %v1012_v25 = vld [vmem:[%s6007_s3 + $0x270] sm:$0xff] }
  0x27   : > { %v1010_v19 = vld [vmem:[%s6007_s3 + $0x260] sm:$0xff]  ;;  %v995_v23 = vld [vmem:[%s6007_s3 + $0x1e8] sm:$0xff]  ;;  %v4065_v27 = vpack.c.bf16 %v1013_v26, %v1012_v25  ;;  %v996_v28 = vld [vmem:[%s6007_s3 + $0x1f0] sm:$0xff] }
  0x28   : > { %3578 = vmatmul.mubr.f32.vlgmr.msra.gmra.mrb[0].mxu0 %v388_v2  ;;  %4004 = vmatpush3.bf16.msra.mxu1 %v4003_v34  ;;  %v1005_v2 = vld [vmem:[%s6007_s3 + $0x238] sm:$0xff]  ;;  %v4061_v21 = vpack.c.bf16 %v1011_v20, %v1010_v19  ;;  %v994_v22 = vld [vmem:[%s6007_s3 + $0x1e0] sm:$0xff]  ;;  %v1338_v32 = vld [vmem:[%s6007_s3 + $0x388] sm:$0xff] }
  0x29   : > { %3580 = vmatprep.mubr.f32.mxu0 %v389_v3  ;;  %4008 = vmatpush3.bf16.msra.mxu0 %v4005_v63  ;;  %v987_v63 = vld [vmem:[%s6007_s3 + $0x1a8] sm:$0xff]  ;;  %v4049_v3 = vpack.c.bf16 %v1005_v2, %v1004_v1  ;;  %v4063_v24 = vpack.c.bf16 %v995_v23, %v994_v22  ;;  %v1337_v31 = vld [vmem:[%s6007_s3 + $0x380] sm:$0xff]  ;;  %v1016_v50 = vld [vmem:[%s6007_s3 + $0x290] sm:$0xff] }
  0x2a   : > { %4010 = vmatprep.subr.bf16.mxu0 %v4009_v4  ;;  %4038 = vmatprep.subr.bf16.mxu1 %v4037_v45  ;;  %v4047_v0 = vpack.c.bf16 %v987_v63, %v986_v62  ;;  %v4101_v33 = vpack.c.bf16 %v1338_v32, %v1337_v31  ;;  %v2984_v34 = vld [vmem:[%s6006_s2] ss:$0 sm:$0xff]  ;;  %v1017_v52 = vld [vmem:[%s6007_s3 + $0x298] sm:$0xff]  ;;  %v1019_v63 = vld [vmem:[%s6007_s3 + $0x2a8] sm:$0xff] }
  0x2b   : > { %751 = vmatmul.mubr.f32.vlgmr.msra.gmra.mrb[0].mxu1 %v566_v39  ;;  %v4073_v57 = vpack.c.bf16 %v1017_v52, %v1016_v50  ;;  %v1025_v19 = vld [vmem:[%s6007_s3 + $0x2d8] sm:$0xff]  ;;  %v1026_v22 = vld [vmem:[%s6007_s3 + $0x2e0] sm:$0xff]  ;;  %v1027_v23 = vld [vmem:[%s6007_s3 + $0x2e8] sm:$0xff] }
  0x2c   : > { %3581 = vmatmul.mubr.f32.gmra.mrb[2].mxu0 %v390_v7  ;;  %4040 = vmatpush3.bf16.msra.mxu1 %v4039_v48  ;;  %v1006_v7 = vld [vmem:[%s6007_s3 + $0x240] sm:$0xff]  ;;  %v1028_v26 = vld [vmem:[%s6007_s3 + $0x2f0] sm:$0xff]  ;;  %v1322_v31 = vld [vmem:[%s6007_s3 + $0x308] sm:$0xff] }
  0x2d   : > { %3583 = vmatprep.mubr.f32.mxu0 %v391_v8  ;;  %4012 = vmatpush3.bf16.msra.mxu0 %v4009_v4  ;;  %v988_v4 = vld [vmem:[%s6007_s3 + $0x1b0] sm:$0xff]  ;;  %v1007_v8 = vld [vmem:[%s6007_s3 + $0x248] sm:$0xff]  ;;  %v1353_v32 = vld [vmem:[%s6007_s3 + $0x400] sm:$0xff] }
  0x2e   : > { %4014 = vmatprep.subr.bf16.mxu0 %v4013_v9  ;;  %4042 = vmatprep.subr.bf16.mxu1 %v4041_v55  ;;  %v4051_v6 = vpack.c.bf16 %v989_v5, %v988_v4  ;;  %v1020_v5 = vld [vmem:[%s6007_s3 + $0x2b0] sm:$0xff]  ;;  %v1341_v52 = vld [vmem:[%s6007_s3 + $0x3a0] sm:$0xff] }
  0x2f   : > { %v1355_v50 = vld [vmem:[%s6007_s3 + $0x410] sm:$0xff] }
  0x30   : > { %3584 = vmatmul.mubr.f32.gmra.mrb[4].mxu0 %v392_v12  ;;  %4044 = vmatpush3.bf16.msra.mxu1 %v4043_v58  ;;  %v4055_v12 = vpack.c.bf16 %v991_v11, %v990_v10  ;;  %v1018_v58 = vld [vmem:[%s6007_s3 + $0x2a0] sm:$0xff] }
  0x31   : > { %3586 = vmatprep.mubr.f32.mxu0 %v393_v13  ;;  %4016 = vmatpush3.bf16.msra.mxu0 %v4013_v9  ;;  %v4053_v9 = vpack.c.bf16 %v1007_v8, %v1006_v7  ;;  %v1008_v13 = vld [vmem:[%s6007_s3 + $0x250] sm:$0xff]  ;;  %v4077_v4 = vpack.c.bf16 %v1019_v63, %v1018_v58  ;;  %v1022_v11 = vld [vmem:[%s6007_s3 + $0x2c0] sm:$0xff] }
  0x32   : > { %4018 = vmatprep.subr.bf16.mxu0 %v4017_v14  ;;  %4046 = vmatprep.subr.bf16.mxu1 %v4045_v61  ;;  %v1357_v63 = vld [vmem:[%s6007_s3 + $0x420] sm:$0xff] }
  0x34   : > { %3587 = vmatmul.mubr.f32.gmra.mrb[6].mxu0 %v394_v17  ;;  %4048 = vmatpush3.bf16.msra.mxu1 %v4047_v0  ;;  %v993_v17 = vld [vmem:[%s6007_s3 + $0x1d8] sm:$0xff] }
  0x35   : > { %4020 = vmatpush3.bf16.msra.mxu0 %v4017_v14  ;;  %3621 = vmatprep.mubr.f32.mxu0 %v598_v54  ;;  %v1009_v14 = vld [vmem:[%s6007_s3 + $0x258] sm:$0xff] }
  0x36   : > { %4022 = vmatprep.subr.bf16.mxu0 %v4021_v18  ;;  %4050 = vmatprep.subr.bf16.mxu1 %v4049_v3  ;;  %v4057_v15 = vpack.c.bf16 %v1009_v14, %v1008_v13  ;;  %v1023_v14 = vld [vmem:[%s6007_s3 + $0x2c8] sm:$0xff] }
  0x38   : > { %4052 = vmatpush3.bf16.msra.mxu1 %v4051_v6  ;;  %v1021_v6 = vld [vmem:[%s6007_s3 + $0x2b8] sm:$0xff] }
  0x39   : > { %4024 = vmatpush3.bf16.msra.mxu0 %v4021_v18  ;;  %4054 = vmatprep.subr.bf16.mxu1 %v4053_v9  ;;  %v4059_v18 = vpack.c.bf16 %v993_v17, %v992_v16  ;;  %v4081_v10 = vpack.c.bf16 %v1021_v6, %v1020_v5  ;;  %v1024_v16 = vld [vmem:[%s6007_s3 + $0x2d0] sm:$0xff]  ;;  %v1344_v6 = vld [vmem:[%s6007_s3 + $0x3b8] sm:$0xff] }
  0x3a   : > { %4026 = vmatprep.subr.bf16.mxu0 %v4025_v29  ;;  %v1343_v5 = vld [vmem:[%s6007_s3 + $0x3b0] sm:$0xff] }
  0x3c   : > { %4056 = vmatpush3.bf16.msra.mxu1 %v4055_v12 }
  0x3d   : > { %4028 = vmatpush3.bf16.msra.mxu0 %v4025_v29  ;;  %4058 = vmatprep.subr.bf16.mxu1 %v4057_v15  ;;  %v997_v29 = vld [vmem:[%s6007_s3 + $0x1f8] sm:$0xff]  ;;  %v4085_v15 = vpack.c.bf16 %v1023_v14, %v1022_v11  ;;  %v4113_v14 = vpack.c.bf16 %v1344_v6, %v1343_v5 }
  0x3e   : > { %4030 = vmatprep.subr.bf16.mxu0 %v4029_v37  ;;  %v4067_v30 = vpack.c.bf16 %v997_v29, %v996_v28  ;;  %v1352_v5 = vld [vmem:[%s6007_s3 + $0x3f8] sm:$0xff] }
  0x40   : > { %4060 = vmatpush3.bf16.msra.mxu1 %v4059_v18 }
  0x41   : > { %4032 = vmatpush3.bf16.msra.mxu0 %v4029_v37  ;;  %4062 = vmatprep.subr.bf16.mxu1 %v4061_v21  ;;  %v4089_v21 = vpack.c.bf16 %v1025_v19, %v1024_v16  ;;  %v1328_v16 = vld [vmem:[%s6007_s3 + $0x338] sm:$0xff]  ;;  %v1359_v19 = vld [vmem:[%s6007_s3 + $0x430] sm:$0xff] }
  0x42   : > { %4034 = vmatprep.subr.bf16.mxu0 %v4033_v42 }
  0x44   : > { %4064 = vmatpush3.bf16.msra.mxu1 %v4063_v24  ;;  %v4093_v24 = vpack.c.bf16 %v1027_v23, %v1026_v22  ;;  %v1345_v22 = vld [vmem:[%s6007_s3 + $0x3c0] sm:$0xff]  ;;  %v1346_v23 = vld [vmem:[%s6007_s3 + $0x3c8] sm:$0xff] }
  0x45   : > { %4036 = vmatpush3.bf16.msra.mxu0 %v4033_v42  ;;  %4066 = vmatprep.subr.bf16.mxu1 %v4065_v27  ;;  %v1029_v27 = vld [vmem:[%s6007_s3 + $0x2f8] sm:$0xff] }
  0x46   : > { %4070 = vmatprep.subr.bf16.mxu0 %v4847_v51  ;;  %v4097_v29 = vpack.c.bf16 %v1029_v27, %v1028_v26  ;;  %v4117_v27 = vpack.c.bf16 %v1346_v23, %v1345_v22 }
  0x48   : > { %4068 = vmatpush3.bf16.msra.mxu1 %v4067_v30  ;;  %v1321_v30 = vld [vmem:[%s6007_s3 + $0x300] sm:$0xff] }
  0x49   : > { %4102 = vmatprep.subr.bf16.mxu1 %v4101_v33  ;;  %v1354_v33 = vld [vmem:[%s6007_s3 + $0x408] sm:$0xff] }
  0xfb   : > { %v3579_v35 = vpop.f32.mrb[0].mxu0 }
  0xfc   : > { %v4943_v36 = vadd.f32 %v3579_v35, %v2984_v34  ;;  %v484_v37 = vpop.f32.mrb[1].mxu0  ;;  %v1340_v35 = vld [vmem:[%s6007_s3 + $0x398] sm:$0xff] }
  0xfd   : > { %v4945_v38 = vadd.f32 %v2984_v34, %v484_v37  ;;  %v4103_v37 = vpack.c.bf16 %v1322_v31, %v1321_v30  ;;  %v1330_v30 = vld [vmem:[%s6007_s3 + $0x348] sm:$0xff]  ;;  %v1361_v31 = vld [vmem:[%s6007_s3 + $0x440] sm:$0xff] }
  0xfe   : > { %v4948_v39 = vmax.f32 %v4943_v36, 0.0 }
  0xff   : > { %v4951_v40 = vmax.f32 %v4945_v38, 0.0  ;;  %v3582_v41 = vpop.f32.mrb[2].mxu0 }
 0x100   : > { %558 = vst [vmem:[#allocation3 + $0x21] sm:$0xff] %v4948_v39  ;;  %v4954_v42 = vadd.f32 %v3582_v41, %v2984_v34  ;;  %v494_v43 = vpop.f32.mrb[3].mxu0  ;;  %v4133_v41 = vpack.c.bf16 %v1354_v33, %v1353_v32  ;;  %v1362_v32 = vld [vmem:[%s6007_s3 + $0x448] sm:$0xff]  ;;  %v1347_v33 = vld [vmem:[%s6007_s3 + $0x3d0] sm:$0xff] }
 0x101   : > { %557 = vst [vmem:[#allocation3 + $0x11] sm:$0xff] %v4951_v40  ;;  %v4957_v44 = vadd.f32 %v2984_v34, %v494_v43  ;;  %755 = vmatprep.mubr.f32.mxu1 %v4951_v40 }
 0x102   : > { %v4961_v45 = vmax.f32 %v4954_v42, 0.0 }
 0x103   : > { %v4964_v46 = vmax.f32 %v4957_v44, 0.0  ;;  %v3585_v47 = vpop.f32.mrb[4].mxu0 }
 0x104   : > { %560 = vst [vmem:[#allocation3 + $0x41] sm:$0xff] %v4961_v45  ;;  %v4967_v48 = vadd.f32 %v3585_v47, %v2984_v34  ;;  %v504_v49 = vpop.f32.mrb[5].mxu0  ;;  %v1323_v47 = vld [vmem:[%s6007_s3 + $0x310] sm:$0xff] }
 0x105   : > { %559 = vst [vmem:[#allocation3 + $0x31] sm:$0xff] %v4964_v46  ;;  %v4976_v53 = vadd.f32 %v2984_v34, %v504_v49  ;;  %v1324_v49 = vld [vmem:[%s6007_s3 + $0x318] sm:$0xff] }
 0x106   : > { %v4979_v54 = vmax.f32 %v4967_v48, 0.0 }
 0x107   : > { %v4982_v55 = vmax.f32 %v4976_v53, 0.0  ;;  %v3588_v56 = vpop.f32.mrb[6].mxu0  ;;  %v4999_v1 = vld [vmem:[#allocation3 + $0x22] sm:$0xff] }
 0x108   : > { %562 = vst [vmem:[#allocation3 + $0x61] sm:$0xff] %v4979_v54  ;;  %v4988_v59 = vadd.f32 %v3588_v56, %v2984_v34  ;;  %v514_v60 = vpop.f32.mrb[7].mxu0  ;;  %v599_v61 = vld [vmem:[#allocation3 + $0x12] sm:$0xff]  ;;  %v5019_v7 = vld [vmem:[#allocation3 + $0x20] sm:$0xff]  ;;  %v1342_v56 = vld [vmem:[%s6007_s3 + $0x3a8] sm:$0xff] }
 0x109   : > { %v4990_v62 = vld [vmem:[#allocation3 + $0x10] sm:$0xff]  ;;  %561 = vst [vmem:[#allocation3 + $0x51] sm:$0xff] %v4982_v55  ;;  %v4996_v0 = vadd.f32 %v2984_v34, %v514_v60  ;;  %3622 = vmatmul.mubr.f32.vlgmr.msra.gmra.mrb[8].mxu0 %v599_v61  ;;  %v4109_v60 = vpack.c.bf16 %v1342_v56, %v1341_v52  ;;  %v1349_v52 = vld [vmem:[%s6007_s3 + $0x3e0] sm:$0xff]  ;;  %v1350_v56 = vld [vmem:[%s6007_s3 + $0x3e8] sm:$0xff] }
 0x10a   : > { %756 = vmatmul.mubr.f32.gmra.mrb[2].mxu1 %v4990_v62  ;;  %v5002_v2 = vmax.f32 %v4988_v59, 0.0  ;;  %4072 = vmatpush3.bf16.msra.mxu0 %v4847_v51  ;;  %v1339_v34 = vld [vmem:[%s6007_s3 + $0x390] sm:$0xff] }
 0x10b   : > { %3624 = vmatprep.mubr.f32.mxu0 %v4999_v1  ;;  %v5007_v3 = vmax.f32 %v4996_v0, 0.0  ;;  %760 = vmatprep.mubr.f32.mxu1 %v4948_v39  ;;  %v5021_v8 = vld [vmem:[#allocation3 + $0x42] sm:$0xff]  ;;  %v4105_v43 = vpack.c.bf16 %v1340_v35, %v1339_v34  ;;  %v1348_v34 = vld [vmem:[%s6007_s3 + $0x3d8] sm:$0xff] }
 0x10c   : > { %4074 = vmatprep.subr.bf16.mxu0 %v4073_v57  ;;  %564 = vst [vmem:[#allocation3 + $0x81] sm:$0xff] %v5002_v2  ;;  %v5017_v51 = vld [vmem:[#allocation3 + $0x32] sm:$0xff]  ;;  %v5049_v18 = vld [vmem:[#allocation3 + $0x40] sm:$0xff] }
 0x10d   : > { %563 = vst [vmem:[#allocation3 + $0x71] sm:$0xff] %v5007_v3  ;;  %3625 = vmatmul.mubr.f32.gmra.mrb[10].mxu0 %v5017_v51  ;;  %v5027_v9 = vld [vmem:[#allocation3 + $0x30] sm:$0xff] }
 0x10e   : > { %761 = vmatmul.mubr.f32.gmra.mrb[4].mxu1 %v5019_v7  ;;  %4076 = vmatpush3.bf16.msra.mxu0 %v4073_v57  ;;  %v4107_v57 = vpack.c.bf16 %v1324_v49, %v1323_v47  ;;  %v4149_v47 = vpack.c.bf16 %v1362_v32, %v1361_v31  ;;  %v4121_v49 = vpack.c.bf16 %v1348_v34, %v1347_v33  ;;  %v1607_v32 = vld [vmem:[%s6009_s5 + $0x60] sm:$0xff]  ;;  %v1608_v33 = vld [vmem:[%s6009_s5 + $0x68] sm:$0xff] }
 0x10f   : > { %765 = vmatprep.mubr.f32.mxu1 %v4964_v46  ;;  %3627 = vmatprep.mubr.f32.mxu0 %v5021_v8  ;;  %v5035_v13 = vld [vmem:[#allocation3 + $0x62] sm:$0xff]  ;;  %v4189_v34 = vpack.c.bf16 %v1608_v33, %v1607_v32 }
 0x110   : > { %4078 = vmatprep.subr.bf16.mxu0 %v4077_v4  ;;  %v5033_v12 = vld [vmem:[#allocation3 + $0x52] sm:$0xff]  ;;  %v5067_v25 = vld [vmem:[#allocation3 + $0x60] sm:$0xff] }
 0x111   : > { %3628 = vmatmul.mubr.f32.gmra.mrb[12].mxu0 %v5033_v12  ;;  %v5056_v20 = vld [vmem:[#allocation3 + $0x50] sm:$0xff] }
 0x112   : > { %766 = vmatmul.mubr.f32.gmra.mrb[6].mxu1 %v5027_v9  ;;  %4080 = vmatpush3.bf16.msra.mxu0 %v4077_v4  ;;  %v1358_v4 = vld [vmem:[%s6007_s3 + $0x428] sm:$0xff] }
 0x113   : > { %770 = vmatprep.mubr.f32.mxu1 %v4961_v45  ;;  %3630 = vmatprep.mubr.f32.mxu0 %v5035_v13  ;;  %v4141_v11 = vpack.c.bf16 %v1358_v4, %v1357_v63  ;;  %v1366_v63 = vld [vmem:[%s6007_s3 + $0x468] sm:$0xff]  ;;  %v1351_v4 = vld [vmem:[%s6007_s3 + $0x3f0] sm:$0xff]  ;;  %v917_v23 = vld [vmem:[#allocation3 + $0x80] sm:$0xff] }
 0x114   : > { %4082 = vmatprep.subr.bf16.mxu0 %v4081_v10  ;;  %v5047_v17 = vld [vmem:[#allocation3 + $0x72] sm:$0xff] }
 0x115   : > { %3631 = vmatmul.mubr.f32.gmra.mrb[14].mxu0 %v5047_v17  ;;  %v5077_v28 = vld [vmem:[#allocation3 + $0x70] sm:$0xff] }
 0x116   : > { %771 = vmatmul.mubr.f32.gmra.mrb[8].mxu1 %v5049_v18  ;;  %4084 = vmatpush3.bf16.msra.mxu0 %v4081_v10 }
 0x117   : > { %3665 = vmatprep.mubr.f32.mxu0 %v599_v61  ;;  %775 = vmatprep.mubr.f32.mxu1 %v4982_v55  ;;  %v1325_v61 = vld [vmem:[%s6007_s3 + $0x320] sm:$0xff] }
 0x118   : > { %4086 = vmatprep.subr.bf16.mxu0 %v4085_v15 }
 0x11a   : > { %776 = vmatmul.mubr.f32.gmra.mrb[10].mxu1 %v5056_v20  ;;  %4088 = vmatpush3.bf16.msra.mxu0 %v4085_v15  ;;  %v1327_v15 = vld [vmem:[%s6007_s3 + $0x330] sm:$0xff] }
 0x11b   : > { %780 = vmatprep.mubr.f32.mxu1 %v4979_v54  ;;  %4090 = vmatprep.subr.bf16.mxu0 %v4089_v21 }
 0x11e   : > { %781 = vmatmul.mubr.f32.gmra.mrb[12].mxu1 %v5067_v25  ;;  %4092 = vmatpush3.bf16.msra.mxu0 %v4089_v21  ;;  %v1360_v21 = vld [vmem:[%s6007_s3 + $0x438] sm:$0xff] }
 0x11f   : > { %785 = vmatprep.mubr.f32.mxu1 %v5007_v3  ;;  %4094 = vmatprep.subr.bf16.mxu0 %v4093_v24  ;;  %v4145_v26 = vpack.c.bf16 %v1360_v21, %v1359_v19  ;;  %v1368_v19 = vld [vmem:[%s6007_s3 + $0x478] sm:$0xff] }
 0x122   : > { %786 = vmatmul.mubr.f32.gmra.mrb[14].mxu1 %v5077_v28  ;;  %4096 = vmatpush3.bf16.msra.mxu0 %v4093_v24  ;;  %v4115_v24 = vpack.c.bf16 %v1328_v16, %v1327_v15  ;;  %v1336_v15 = vld [vmem:[%s6007_s3 + $0x378] sm:$0xff]  ;;  %v1367_v16 = vld [vmem:[%s6007_s3 + $0x470] sm:$0xff] }
 0x123   : > { %1094 = vmatprep.mubr.f32.mxu1 %v4951_v40  ;;  %4098 = vmatprep.subr.bf16.mxu0 %v4097_v29  ;;  %v1356_v40 = vld [vmem:[%s6007_s3 + $0x418] sm:$0xff]  ;;  %v4161_v22 = vpack.c.bf16 %v1368_v19, %v1367_v16 }
 0x124   : > { %v4137_v58 = vpack.c.bf16 %v1356_v40, %v1355_v50  ;;  %v1363_v50 = vld [vmem:[%s6007_s3 + $0x450] sm:$0xff]  ;;  %v1364_v40 = vld [vmem:[%s6007_s3 + $0x458] sm:$0xff] }
 0x125   : > { %v1843_v16 = vld [vmem:[%s6011_s7 + $0xb8] sm:$0xff] }
 0x126   : > { %1095 = vmatmul.mubr.f32.vlgmr.msra.gmra.mrb[16].mxu1 %v4990_v62  ;;  %4100 = vmatpush3.bf16.msra.mxu0 %v4097_v29  ;;  %v1326_v62 = vld [vmem:[%s6007_s3 + $0x328] sm:$0xff]  ;;  %v1329_v29 = vld [vmem:[%s6007_s3 + $0x340] sm:$0xff] }
 0x127   : > { %4104 = vmatpush3.bf16.msra.mxu1 %v4103_v37  ;;  %1099 = vmatprep.mubr.f32.mxu1 %v4948_v39  ;;  %v4111_v10 = vpack.c.bf16 %v1326_v62, %v1325_v61  ;;  %v4119_v35 = vpack.c.bf16 %v1330_v30, %v1329_v29  ;;  %v1331_v37 = vld [vmem:[%s6007_s3 + $0x350] sm:$0xff]  ;;  %v4125_v61 = vpack.c.bf16 %v1350_v56, %v1349_v52  ;;  %v1334_v62 = vld [vmem:[%s6007_s3 + $0x368] sm:$0xff]  ;;  %v1606_v30 = vld [vmem:[%s6009_s5 + $0x58] sm:$0xff] }
 0x128   : > { %4134 = vmatprep.subr.bf16.mxu0 %v4133_v41  ;;  %4106 = vmatprep.subr.bf16.mxu1 %v4105_v43  ;;  %v5191_v43 = vld [vmem:[#allocation3 + $0x82] sm:$0xff]  ;;  %v1605_v29 = vld [vmem:[%s6009_s5 + $0x50] sm:$0xff] }
 0x129   : > { %3666 = vmatmul.mubr.f32.vlgmr.msra.gmra.mrb[8].mxu0 %v4999_v1  ;;  %v4185_v31 = vpack.c.bf16 %v1606_v30, %v1605_v29  ;;  %v1852_v52 = vld [vmem:[%s6011_s7 + $0x100] sm:$0xff]  ;;  %v1853_v56 = vld [vmem:[%s6011_s7 + $0x108] sm:$0xff] }
 0x12a   : > { %1100 = vmatmul.mubr.f32.gmra.mrb[18].mxu1 %v5019_v7  ;;  %3668 = vmatprep.mubr.f32.mxu0 %v5017_v51 }
 0x12b   : > { %4136 = vmatpush3.bf16.msra.mxu0 %v4133_v41  ;;  %4108 = vmatpush3.bf16.msra.mxu1 %v4107_v57  ;;  %v1332_v41 = vld [vmem:[%s6007_s3 + $0x358] sm:$0xff] }
 0x12c   : > { %1104 = vmatprep.mubr.f32.mxu1 %v4964_v46  ;;  %4138 = vmatprep.subr.bf16.mxu0 %v4137_v58  ;;  %v4123_v57 = vpack.c.bf16 %v1332_v41, %v1331_v37  ;;  %v1610_v37 = vld [vmem:[%s6009_s5 + $0x78] sm:$0xff] }
 0x12d   : > { %4110 = vmatprep.subr.bf16.mxu1 %v4109_v60  ;;  %3669 = vmatmul.mubr.f32.gmra.mrb[10].mxu0 %v5021_v8  ;;  %v1333_v60 = vld [vmem:[%s6007_s3 + $0x360] sm:$0xff] }
 0x12e   : > { %1105 = vmatmul.mubr.f32.gmra.mrb[20].mxu1 %v5027_v9  ;;  %3671 = vmatprep.mubr.f32.mxu0 %v5033_v12  ;;  %v4127_v6 = vpack.c.bf16 %v1334_v62, %v1333_v60  ;;  %v1838_v60 = vld [vmem:[%s6011_s7 + $0x90] sm:$0xff] }
 0x12f   : > { %4140 = vmatpush3.bf16.msra.mxu0 %v4137_v58  ;;  %4112 = vmatpush3.bf16.msra.mxu1 %v4111_v10  ;;  %v4153_v58 = vpack.c.bf16 %v1364_v40, %v1363_v50  ;;  %v1821_v40 = vld [vmem:[%s6011_s7 + $0x8] sm:$0xff]  ;;  %v1822_v62 = vld [vmem:[%s6011_s7 + $0x10] sm:$0xff] }
 0x130   : > { %1109 = vmatprep.mubr.f32.mxu1 %v4961_v45  ;;  %4142 = vmatprep.subr.bf16.mxu0 %v4141_v11 }
 0x131   : > { %4114 = vmatprep.subr.bf16.mxu1 %v4113_v14  ;;  %3672 = vmatmul.mubr.f32.gmra.mrb[12].mxu0 %v5035_v13  ;;  %v4129_v14 = vpack.c.bf16 %v1352_v5, %v1351_v4  ;;  %v1840_v5 = vld [vmem:[%s6011_s7 + $0xa0] sm:$0xff] }
 0x132   : > { %1110 = vmatmul.mubr.f32.gmra.mrb[22].mxu1 %v5049_v18  ;;  %3674 = vmatprep.mubr.f32.mxu0 %v5047_v17 }
 0x133   : > { %4144 = vmatpush3.bf16.msra.mxu0 %v4141_v11  ;;  %4116 = vmatpush3.bf16.msra.mxu1 %v4115_v24  ;;  %v1335_v11 = vld [vmem:[%s6007_s3 + $0x370] sm:$0xff]  ;;  %v1603_v24 = vld [vmem:[%s6009_s5 + $0x40] sm:$0xff] }
 0x134   : > { %1114 = vmatprep.mubr.f32.mxu1 %v4982_v55  ;;  %4146 = vmatprep.subr.bf16.mxu0 %v4145_v26  ;;  %v4131_v21 = vpack.c.bf16 %v1336_v15, %v1335_v11  ;;  %v1824_v11 = vld [vmem:[%s6011_s7 + $0x20] sm:$0xff]  ;;  %v1842_v15 = vld [vmem:[%s6011_s7 + $0xb0] sm:$0xff] }
 0x135   : > { %4118 = vmatprep.subr.bf16.mxu1 %v4117_v27  ;;  %3675 = vmatmul.mubr.f32.gmra.mrb[14].mxu0 %v5191_v43 }
 0x136   : > { %1115 = vmatmul.mubr.f32.gmra.mrb[24].mxu1 %v5056_v20  ;;  %3709 = vmatprep.mubr.f32.mxu0 %v4999_v1  ;;  %v1365_v1 = vld [vmem:[%s6007_s3 + $0x460] sm:$0xff] }
 0x137   : > { %4148 = vmatpush3.bf16.msra.mxu0 %v4145_v26  ;;  %4120 = vmatpush3.bf16.msra.mxu1 %v4119_v35  ;;  %v4157_v10 = vpack.c.bf16 %v1366_v63, %v1365_v1  ;;  %v1604_v26 = vld [vmem:[%s6009_s5 + $0x48] sm:$0xff]  ;;  %v1609_v35 = vld [vmem:[%s6009_s5 + $0x70] sm:$0xff]  ;;  %v1823_v63 = vld [vmem:[%s6011_s7 + $0x18] sm:$0xff] }
 0x138   : > { %1119 = vmatprep.mubr.f32.mxu1 %v4979_v54  ;;  %4150 = vmatprep.subr.bf16.mxu0 %v4149_v47  ;;  %v4181_v27 = vpack.c.bf16 %v1604_v26, %v1603_v24  ;;  %v4193_v41 = vpack.c.bf16 %v1610_v37, %v1609_v35  ;;  %v4203_v4 = vpack.c.bf16 %v1823_v63, %v1822_v62 }
 0x139   : > { %4122 = vmatprep.subr.bf16.mxu1 %v4121_v49  ;;  %v1820_v49 = vld [vmem:[%s6011_s7] sm:$0xff] }
 0x13a   : > { %1120 = vmatmul.mubr.f32.gmra.mrb[26].mxu1 %v5067_v25 }
 0x13b   : > { %4152 = vmatpush3.bf16.msra.mxu0 %v4149_v47  ;;  %1124 = vmatprep.mubr.f32.mxu1 %v5007_v3  ;;  %v1837_v47 = vld [vmem:[%s6011_s7 + $0x88] sm:$0xff] }
 0x13c   : > { %4124 = vmatpush3.bf16.msra.mxu1 %v4123_v57  ;;  %4154 = vmatprep.subr.bf16.mxu0 %v4153_v58  ;;  %v4199_v57 = vpack.c.bf16 %v1821_v40, %v1820_v49 }
 0x13d   : > { %4126 = vmatprep.subr.bf16.mxu1 %v4125_v61  ;;  %v1839_v61 = vld [vmem:[%s6011_s7 + $0x98] sm:$0xff] }
 0x13e   : > { %1125 = vmatmul.mubr.f32.gmra.mrb[28].mxu1 %v5077_v28  ;;  %v4201_v1 = vpack.c.bf16 %v1839_v61, %v1838_v60 }
 0x13f   : > { %4156 = vmatpush3.bf16.msra.mxu0 %v4153_v58  ;;  %1129 = vmatprep.mubr.f32.mxu1 %v5002_v2  ;;  %v5330_v58 = vpack.c.bf16 %v1853_v56, %v1852_v52 }
 0x140   : > { %4128 = vmatpush3.bf16.msra.mxu1 %v4127_v6  ;;  %4158 = vmatprep.subr.bf16.mxu0 %v4157_v10  ;;  %v1841_v6 = vld [vmem:[%s6011_s7 + $0xa8] sm:$0xff] }
 0x141   : > { %4130 = vmatprep.subr.bf16.mxu1 %v4129_v14  ;;  %v1825_v14 = vld [vmem:[%s6011_s7 + $0x28] sm:$0xff] }
 0x142   : > { %1130 = vmatmul.mubr.f32.gmra.mrb[30].mxu1 %v917_v23  ;;  %v4207_v19 = vpack.c.bf16 %v1825_v14, %v1824_v11 }
 0x143   : > { %4160 = vmatpush3.bf16.msra.mxu0 %v4157_v10  ;;  %1433 = vmatprep.mubr.f32.mxu1 %v4948_v39  ;;  %v1288_v39 = vld [vmem:[#allocation3 + $0x92] sm:$0xff]  ;;  %v4205_v10 = vpack.c.bf16 %v1841_v6, %v1840_v5 }
 0x144   : > { %4132 = vmatpush3.bf16.msra.mxu1 %v4131_v21  ;;  %4162 = vmatprep.subr.bf16.mxu0 %v4161_v22  ;;  %v4209_v21 = vpack.c.bf16 %v1843_v16, %v1842_v15 }
 0x147   : > { %4164 = vmatpush3.bf16.msra.mxu0 %v4161_v22  ;;  %1434 = vmatmul.mubr.f32.vlgmr.msra.gmra.mrb[32].mxu1 %v5019_v7  ;;  %v1256_v7 = vld [vmem:[#allocation3 + $0x90] sm:$0xff] }
 0x148   : > { %1438 = vmatprep.mubr.f32.mxu1 %v4964_v46  ;;  %v3049_v46 = vpop.f32.mrb[0].mxu1  ;;  %v1826_v22 = vld [vmem:[%s6011_s7 + $0x30] sm:$0xff] }
 0x14a   : > { %3710 = vmatmul.mubr.f32.vlgmr.msra.gmra.mrb[8].mxu0 %v5017_v51 }
 0x14b   : > { %3712 = vmatprep.mubr.f32.mxu0 %v5021_v8  ;;  %1439 = vmatmul.mubr.f32.gmra.mrb[34].mxu1 %v5027_v9  ;;  %v1596_v8 = vld [vmem:[%s6009_s5 + $0x8] sm:$0xff] }
 0x14c   : > { %1443 = vmatprep.mubr.f32.mxu1 %v4961_v45  ;;  %v3050_v45 = vpop.f32.mrb[1].mxu1 }
 0x14d   : > { %v5259_v51 = vadd.f32 %v3050_v45, %v3049_v46  ;;  %v1845_v46 = vld [vmem:[%s6011_s7 + $0xc8] sm:$0xff] }
 0x14e   : > { %3713 = vmatmul.mubr.f32.gmra.mrb[10].mxu0 %v5033_v12 }
 0x14f   : > { %3715 = vmatprep.mubr.f32.mxu0 %v5035_v13  ;;  %1444 = vmatmul.mubr.f32.gmra.mrb[36].mxu1 %v5049_v18  ;;  %v1599_v13 = vld [vmem:[%s6009_s5 + $0x20] sm:$0xff] }
 0x150   : > { %1448 = vmatprep.mubr.f32.mxu1 %v4982_v55  ;;  %v1272_v55 = vld [vmem:[#allocation3 + $0x91] sm:$0xff] }
 0x152   : > { %3716 = vmatmul.mubr.f32.gmra.mrb[12].mxu0 %v5047_v17  ;;  %v1600_v17 = vld [vmem:[%s6009_s5 + $0x28] sm:$0xff] }
 0x153   : > { %3718 = vmatprep.mubr.f32.mxu0 %v5191_v43  ;;  %1449 = vmatmul.mubr.f32.gmra.mrb[38].mxu1 %v5056_v20  ;;  %v4173_v18 = vpack.c.bf16 %v1600_v17, %v1599_v13  ;;  %v1601_v20 = vld [vmem:[%s6009_s5 + $0x30] sm:$0xff]  ;;  %v1836_v43 = vld [vmem:[%s6011_s7 + $0x80] sm:$0xff] }
 0x154   : > { %1453 = vmatprep.mubr.f32.mxu1 %v4979_v54  ;;  %v1595_v54 = vld [vmem:[%s6009_s5] sm:$0xff]  ;;  %v4197_v50 = vpack.c.bf16 %v1837_v47, %v1836_v43 }
 0x155   : > { %v4165_v9 = vpack.c.bf16 %v1596_v8, %v1595_v54  ;;  %v1829_v54 = vld [vmem:[%s6011_s7 + $0x48] sm:$0xff] }
 0x156   : > { %3719 = vmatmul.mubr.f32.gmra.mrb[14].mxu0 %v1288_v39  ;;  %4198 = vmatprep.subr.bf16.mxu0 %v4197_v50  ;;  %v1844_v39 = vld [vmem:[%s6011_s7 + $0xc0] sm:$0xff] }
 0x157   : > { %1454 = vmatmul.mubr.f32.gmra.mrb[40].mxu1 %v5067_v25  ;;  %4166 = vmatprep.subr.bf16.mxu1 %v4165_v9  ;;  %v1602_v25 = vld [vmem:[%s6009_s5 + $0x38] sm:$0xff] }
 0x158   : > { %1458 = vmatprep.mubr.f32.mxu1 %v5007_v3  ;;  %4168 = vmatpush3.bf16.msra.mxu1 %v4165_v9  ;;  %v1598_v3 = vld [vmem:[%s6009_s5 + $0x18] sm:$0xff] }
 0x159   : > { %4200 = vmatpush3.bf16.msra.mxu0 %v4199_v57 }
 0x15a   : > { %4202 = vmatprep.subr.bf16.mxu0 %v4201_v1 }
 0x15b   : > { %1459 = vmatmul.mubr.f32.gmra.mrb[42].mxu1 %v5077_v28  ;;  %v4177_v28 = vpack.c.bf16 %v1602_v25, %v1601_v20 }
 0x15c   : > { %1463 = vmatprep.mubr.f32.mxu1 %v5002_v2  ;;  %v1597_v2 = vld [vmem:[%s6009_s5 + $0x10] sm:$0xff] }
 0x15d   : > { %v4169_v12 = vpack.c.bf16 %v1598_v3, %v1597_v2  ;;  %4204 = vmatpush3.bf16.msra.mxu0 %v4203_v4 }
 0x15e   : > { %4206 = vmatprep.subr.bf16.mxu0 %v4205_v10 }
 0x15f   : > { %1464 = vmatmul.mubr.f32.gmra.mrb[44].mxu1 %v917_v23  ;;  %4170 = vmatprep.subr.bf16.mxu1 %v4169_v12  ;;  %v1827_v23 = vld [vmem:[%s6011_s7 + $0x38] sm:$0xff] }
 0x160   : > { %1468 = vmatprep.mubr.f32.mxu1 %v1272_v55  ;;  %4172 = vmatpush3.bf16.msra.mxu1 %v4169_v12  ;;  %v4211_v45 = vpack.c.bf16 %v1827_v23, %v1826_v22  ;;  %v4213_v55 = vpack.c.bf16 %v1845_v46, %v1844_v39 }
 0x161   : > { %4174 = vmatprep.subr.bf16.mxu1 %v4173_v18  ;;  %4208 = vmatpush3.bf16.msra.mxu0 %v4207_v19 }
 0x162   : > { %4210 = vmatprep.subr.bf16.mxu0 %v4209_v21 }
 0x163   : > { %1469 = vmatmul.mubr.f32.gmra.mrb[46].mxu1 %v1256_v7  ;;  %v1828_v7 = vld [vmem:[%s6011_s7 + $0x40] sm:$0xff] }
 0x164   : > { %4176 = vmatpush3.bf16.msra.mxu1 %v4173_v18  ;;  %v4215_v8 = vpack.c.bf16 %v1829_v54, %v1828_v7 }
 0x165   : > { %4178 = vmatprep.subr.bf16.mxu1 %v4177_v28  ;;  %4212 = vmatpush3.bf16.msra.mxu0 %v4211_v45 }
 0x166   : > { %4214 = vmatprep.subr.bf16.mxu0 %v4213_v55 }
 0x168   : > { %4180 = vmatpush3.bf16.msra.mxu1 %v4177_v28 }
 0x169   : > { %4182 = vmatprep.subr.bf16.mxu1 %v4181_v27  ;;  %4216 = vmatpush3.bf16.msra.mxu0 %v4215_v8 }
 0x16c   : > { %4184 = vmatpush3.bf16.msra.mxu1 %v4181_v27 }
 0x16d   : > { %4186 = vmatprep.subr.bf16.mxu1 %v4185_v31 }
 0x170   : > { %4188 = vmatpush3.bf16.msra.mxu1 %v4185_v31 }
 0x171   : > { %4190 = vmatprep.subr.bf16.mxu1 %v4189_v34 }
 0x174   : > { %4192 = vmatpush3.bf16.msra.mxu1 %v4189_v34 }
 0x175   : > { %4194 = vmatprep.subr.bf16.mxu1 %v4193_v41 }
 0x178   : > { %4196 = vmatpush3.bf16.msra.mxu1 %v4193_v41  ;;  %v2985_v41 = vld [vmem:[%s6008_s4] ss:$0 sm:$0xff] }
 0x179   : > { %4230 = vmatprep.subr.bf16.mxu1 %v5330_v58  ;;  %v4441_v49 = vadd.f32 %v5259_v51, %v2985_v41 }
 0x1dd   : > { %v3052_v9 = vpop.f32.mrb[2].mxu1 }
 0x1de   : > { %v3053_v2 = vpop.f32.mrb[3].mxu1 }
 0x1df   : > { %v3054_v3 = vadd.f32 %v3053_v2, %v3052_v9 }
 0x1e1   : > { %v3055_v12 = vpop.f32.mrb[4].mxu1  ;;  %v4437_v57 = vadd.f32 %v3054_v3, %v2985_v41 }
 0x1e2   : > { %v3056_v13 = vpop.f32.mrb[5].mxu1 }
 0x1e3   : > { %v3057_v17 = vadd.f32 %v3056_v13, %v3055_v12 }
 0x1e5   : > { %v3058_v18 = vpop.f32.mrb[6].mxu1  ;;  %v4449_v63 = vadd.f32 %v3057_v17, %v2985_v41 }
 0x1e6   : > { %v3059_v20 = vpop.f32.mrb[7].mxu1 }
 0x1e7   : > { %v3060_v25 = vadd.f32 %v3059_v20, %v3058_v18 }
 0x1e9   : > { %v3061_v28 = vpop.f32.mrb[8].mxu1  ;;  %v4445_v11 = vadd.f32 %v3060_v25, %v2985_v41 }
 0x1ea   : > { %v3062_v24 = vpop.f32.mrb[9].mxu1 }
 0x1eb   : > { %v3063_v26 = vadd.f32 %v3062_v24, %v3061_v28 }
 0x1ed   : > { %v3064_v27 = vpop.f32.mrb[10].mxu1  ;;  %v4457_v51 = vadd.f32 %v3063_v26, %v2985_v41 }
 0x1ee   : > { %v3065_v29 = vpop.f32.mrb[11].mxu1 }
 0x1ef   : > { %v3066_v30 = vadd.f32 %v3065_v29, %v3064_v27 }
 0x1f1   : > { %v3067_v31 = vpop.f32.mrb[12].mxu1  ;;  %v4453_v46 = vadd.f32 %v3066_v30, %v2985_v41 }
 0x1f2   : > { %v3068_v32 = vpop.f32.mrb[13].mxu1 }
 0x1f3   : > { %v3069_v33 = vadd.f32 %v3068_v32, %v3067_v31 }
 0x1f5   : > { %v3070_v34 = vpop.f32.mrb[14].mxu1  ;;  %v4465_v8 = vadd.f32 %v3069_v33, %v2985_v41 }
 0x1f6   : > { %v3071_v35 = vpop.f32.mrb[15].mxu1 }
 0x1f7   : > { %v3072_v37 = vadd.f32 %v3071_v35, %v3070_v34 }
 0x1f9   : > { %v3129_v43 = vpop.f32.mrb[16].mxu1  ;;  %v4461_v13 = vadd.f32 %v3072_v37, %v2985_v41  ;;  %v1854_v37 = vld [vmem:[%s6011_s7 + $0x110] sm:$0xff]  ;;  %v1855_v41 = vld [vmem:[%s6011_s7 + $0x118] sm:$0xff] }
 0x1fa   : > { %v3130_v47 = vpop.f32.mrb[17].mxu1 }
 0x1fb   : > { %v3131_v50 = vadd.f32 %v3130_v47, %v3129_v43 }
 0x1fd   : > { %v4442_v40 = vadd.f32 %v4441_v49, %v3131_v50  ;;  %v3132_v52 = vpop.f32.mrb[18].mxu1 }
 0x1fe   : > { %v3133_v56 = vpop.f32.mrb[19].mxu1 }
 0x1ff   : > { %v3134_v60 = vadd.f32 %v3133_v56, %v3132_v52 }
 0x201   : > { %v4438_v61 = vadd.f32 %v4437_v57, %v3134_v60  ;;  %v3135_v62 = vpop.f32.mrb[20].mxu1 }
 0x202   : > { %v3136_v1 = vpop.f32.mrb[21].mxu1 }
 0x203   : > { %v3137_v4 = vadd.f32 %v3136_v1, %v3135_v62 }
 0x205   : > { %v4450_v5 = vadd.f32 %v4449_v63, %v3137_v4  ;;  %v3138_v6 = vpop.f32.mrb[22].mxu1  ;;  %v1856_v63 = vld [vmem:[%s6011_s7 + $0x120] sm:$0xff]  ;;  %v1857_v4 = vld [vmem:[%s6011_s7 + $0x128] sm:$0xff] }
 0x206   : > { %v3139_v10 = vpop.f32.mrb[23].mxu1 }
 0x207   : > { %v3140_v14 = vadd.f32 %v3139_v10, %v3138_v6 }
 0x209   : > { %v4446_v15 = vadd.f32 %v4445_v11, %v3140_v14  ;;  %v3141_v16 = vpop.f32.mrb[24].mxu1 }
 0x20a   : > { %v3142_v19 = vpop.f32.mrb[25].mxu1 }
 0x20b   : > { %v3143_v21 = vadd.f32 %v3142_v19, %v3141_v16 }
 0x20d   : > { %v5385_v22 = vadd.f32 %v4457_v51, %v3143_v21  ;;  %v3144_v23 = vpop.f32.mrb[26].mxu1  ;;  %v4237_v51 = vpack.c.bf16 %v1857_v4, %v1856_v63  ;;  %v1850_v63 = vld [vmem:[%s6011_s7 + $0xf0] sm:$0xff]  ;;  %v1851_v4 = vld [vmem:[%s6011_s7 + $0xf8] sm:$0xff] }
 0x20e   : > { %v3145_v39 = vpop.f32.mrb[27].mxu1 }
 0x20f   : > { %v3146_v45 = vadd.f32 %v3145_v39, %v3144_v23  ;;  %v1858_v23 = vld [vmem:[%s6011_s7 + $0x130] sm:$0xff]  ;;  %v1859_v39 = vld [vmem:[%s6011_s7 + $0x138] sm:$0xff] }
 0x211   : > { %v5387_v55 = vadd.f32 %v4453_v46, %v3146_v45  ;;  %v3147_v7 = vpop.f32.mrb[28].mxu1 }
 0x212   : > { %v3148_v54 = vpop.f32.mrb[29].mxu1 }
 0x213   : > { %v3149_v9 = vadd.f32 %v3148_v54, %v3147_v7  ;;  %v4241_v54 = vpack.c.bf16 %v1859_v39, %v1858_v23  ;;  %v1866_v23 = vld [vmem:[%s6011_s7 + $0x170] sm:$0xff]  ;;  %v1867_v39 = vld [vmem:[%s6011_s7 + $0x178] sm:$0xff] }
 0x215   : > { %v5389_v2 = vadd.f32 %v4465_v8, %v3149_v9  ;;  %v3150_v3 = vpop.f32.mrb[30].mxu1  ;;  %v1860_v9 = vld [vmem:[%s6011_s7 + $0x140] sm:$0xff] }
 0x216   : > { %v3151_v12 = vpop.f32.mrb[31].mxu1 }
 0x217   : > { %v3152_v17 = vadd.f32 %v3151_v12, %v3150_v3  ;;  %v1861_v3 = vld [vmem:[%s6011_s7 + $0x148] sm:$0xff] }
 0x219   : > { %v5391_v18 = vadd.f32 %v4461_v13, %v3152_v17 }
 0x21a   : > { %v3209_v20 = vpop.f32.mrb[32].mxu1 }
 0x21b   : > { %v3210_v25 = vpop.f32.mrb[33].mxu1 }
 0x21c   : > { %v3211_v28 = vadd.f32 %v3210_v25, %v3209_v20  ;;  %v4245_v25 = vpack.c.bf16 %v1861_v3, %v1860_v9  ;;  %v2196_v9 = vld [vmem:[%s6011_s7 + $0x280] sm:$0xff]  ;;  %v2197_v3 = vld [vmem:[%s6011_s7 + $0x288] sm:$0xff] }
 0x21d   : > { %v3711_v24 = vpop.f32.mrb[8].mxu0 }
 0x21e   : > { %v1540_v26 = vpop.f32.mrb[9].mxu0  ;;  %v4443_v27 = vadd.f32 %v4442_v40, %v3211_v28  ;;  %v3212_v29 = vpop.f32.mrb[34].mxu1 }
 0x21f   : > { %v3213_v30 = vpop.f32.mrb[35].mxu1 }
 0x220   : > { %v4444_v31 = vadd.f32 %v4443_v27, %v1540_v26  ;;  %v3214_v32 = vadd.f32 %v3213_v30, %v3212_v29 }
 0x221   : > { %v3714_v33 = vpop.f32.mrb[10].mxu0 }
 0x222   : > { %v1587_v34 = vmax.f32 %v4444_v31, 0.0  ;;  %v4439_v35 = vadd.f32 %v4438_v61, %v3214_v32  ;;  %v1550_v43 = vpop.f32.mrb[11].mxu0  ;;  %v3215_v47 = vpop.f32.mrb[36].mxu1  ;;  %v4233_v61 = vpack.c.bf16 %v1855_v41, %v1854_v37  ;;  %v1830_v37 = vld [vmem:[%s6011_s7 + $0x50] sm:$0xff] }
 0x223   : > { %v3216_v49 = vpop.f32.mrb[37].mxu1 }
 0x224   : > { %v4440_v50 = vadd.f32 %v4439_v35, %v3711_v24  ;;  %v3217_v40 = vadd.f32 %v3216_v49, %v3215_v47  ;;  %3753 = vmatprep.mubr.f32.mxu1 %v1587_v34  ;;  %v1846_v47 = vld [vmem:[%s6011_s7 + $0xd0] sm:$0xff] }
 0x225   : > { %v3717_v52 = vpop.f32.mrb[12].mxu0 }
 0x226   : > { %v1588_v56 = vmax.f32 %v4440_v50, 0.0  ;;  %v4451_v57 = vadd.f32 %v4450_v5, %v3217_v40  ;;  %v1560_v60 = vpop.f32.mrb[13].mxu0  ;;  %v3218_v62 = vpop.f32.mrb[38].mxu1  ;;  %v1848_v50 = vld [vmem:[%s6011_s7 + $0xe0] sm:$0xff]  ;;  %v1849_v40 = vld [vmem:[%s6011_s7 + $0xe8] sm:$0xff] }
 0x227   : > { %v3219_v1 = vpop.f32.mrb[39].mxu1 }
 0x228   : > { %v3220_v6 = vadd.f32 %v3219_v1, %v3218_v62  ;;  %3754 = vmatmul.mubr.f32.vlgmr.msra.gmra.mrb[48].mxu1 %v1588_v56  ;;  %v4452_v10 = vadd.f32 %v4451_v57, %v1550_v43  ;;  %v1832_v56 = vld [vmem:[%s6011_s7 + $0x60] sm:$0xff]  ;;  %v1833_v57 = vld [vmem:[%s6011_s7 + $0x68] sm:$0xff]  ;;  %v1862_v62 = vld [vmem:[%s6011_s7 + $0x150] sm:$0xff] }
 0x229   : > { %v3720_v11 = vpop.f32.mrb[14].mxu0  ;;  %4232 = vmatpush3.bf16.msra.mxu1 %v5330_v58 }
 0x22a   : > { %v4447_v14 = vadd.f32 %v4446_v15, %v3220_v6  ;;  %v1570_v5 = vpop.f32.mrb[15].mxu0  ;;  %v3221_v16 = vpop.f32.mrb[40].mxu1  ;;  %v1589_v19 = vmax.f32 %v4452_v10, 0.0  ;;  %4234 = vmatprep.subr.bf16.mxu1 %v4233_v61  ;;  %v1834_v6 = vld [vmem:[%s6011_s7 + $0x70] sm:$0xff]  ;;  %v4225_v10 = vpack.c.bf16 %v1851_v4, %v1850_v63  ;;  %v2176_v4 = vld [vmem:[%s6011_s7 + $0x1e0] sm:$0xff] }
 0x22b   : > { %v3222_v21 = vpop.f32.mrb[41].mxu1 }
 0x22c   : > { %v3223_v46 = vadd.f32 %v3222_v21, %v3221_v16  ;;  %3756 = vmatprep.mubr.f32.mxu1 %v1589_v19  ;;  %v4448_v45 = vadd.f32 %v4447_v14, %v3714_v33  ;;  %v1865_v16 = vld [vmem:[%s6011_s7 + $0x168] sm:$0xff]  ;;  %v1748_v21 = vld [vmem:[#allocation3] sm:$0xff] }
 0x22d   : > { %4236 = vmatpush3.bf16.msra.mxu1 %v4233_v61  ;;  %v1863_v61 = vld [vmem:[%s6011_s7 + $0x158] sm:$0xff] }
 0x22e   : > { %v4459_v58 = vadd.f32 %v5385_v22, %v3223_v46  ;;  %v3224_v15 = vpop.f32.mrb[42].mxu1  ;;  %v1590_v7 = vmax.f32 %v4448_v45, 0.0  ;;  %4238 = vmatprep.subr.bf16.mxu1 %v4237_v51  ;;  %v4249_v1 = vpack.c.bf16 %v1863_v61, %v1862_v62  ;;  %v4257_v46 = vpack.c.bf16 %v1867_v39, %v1866_v23  ;;  %v2180_v45 = vld [vmem:[%s6011_s7 + $0x200] sm:$0xff]  ;;  %v2519_v23 = vld [vmem:[%s6011_s7 + $0x388] sm:$0xff] }
 0x22f   : > { %v3225_v8 = vpop.f32.mrb[43].mxu1  ;;  %v2192_v61 = vld [vmem:[%s6011_s7 + $0x260] sm:$0xff] }
 0x230   : > { %v3226_v12 = vadd.f32 %v3225_v8, %v3224_v15  ;;  %3757 = vmatmul.mubr.f32.gmra.mrb[50].mxu1 %v1590_v7  ;;  %v4460_v13 = vadd.f32 %v4459_v58, %v1560_v60  ;;  %v4223_v60 = vpack.c.bf16 %v1833_v57, %v1832_v56  ;;  %v2181_v58 = vld [vmem:[%s6011_s7 + $0x208] sm:$0xff]  ;;  %v2164_v7 = vld [vmem:[%s6011_s7 + $0x180] sm:$0xff]  ;;  %v2174_v57 = vld [vmem:[%s6011_s7 + $0x1d0] sm:$0xff] }
 0x231   : > { %4240 = vmatpush3.bf16.msra.mxu1 %v4237_v51  ;;  %v1764_v51 = vld [vmem:[#allocation3 + $0x1] sm:$0xff]  ;;  %v4261_v15 = vpack.c.bf16 %v2181_v58, %v2180_v45 }
 0x232   : > { %v4455_v17 = vadd.f32 %v5387_v55, %v3226_v12  ;;  %v3227_v22 = vpop.f32.mrb[44].mxu1  ;;  %v1591_v20 = vmax.f32 %v4460_v13, 0.0  ;;  %4242 = vmatprep.subr.bf16.mxu1 %v4241_v54  ;;  %1932 = vmatprep.mubr.f32.mxu0 %v1764_v51  ;;  %v5494_v12 = vpack.c.bf16 %v2197_v3, %v2196_v9  ;;  %v2182_v13 = vld [vmem:[%s6011_s7 + $0x210] sm:$0xff] }
 0x233   : > { %v3228_v28 = vpop.f32.mrb[45].mxu1 }
 0x234   : > { %v3229_v24 = vadd.f32 %v3228_v28, %v3227_v22  ;;  %3759 = vmatprep.mubr.f32.mxu1 %v1591_v20  ;;  %v4456_v26 = vadd.f32 %v4455_v17, %v3717_v52  ;;  %v4221_v52 = vpack.c.bf16 %v1849_v40, %v1848_v50  ;;  %v2183_v17 = vld [vmem:[%s6011_s7 + $0x218] sm:$0xff]  ;;  %v1780_v22 = vld [vmem:[#allocation3 + $0x2] sm:$0xff]  ;;  %v2190_v40 = vld [vmem:[%s6011_s7 + $0x250] sm:$0xff] }
 0x235   : > { %4244 = vmatpush3.bf16.msra.mxu1 %v4241_v54  ;;  %v2165_v54 = vld [vmem:[%s6011_s7 + $0x188] sm:$0xff]  ;;  %v4265_v20 = vpack.c.bf16 %v2183_v17, %v2182_v13  ;;  %v2167_v28 = vld [vmem:[%s6011_s7 + $0x198] sm:$0xff] }
 0x236   : > { %v4467_v27 = vadd.f32 %v5389_v2, %v3229_v24  ;;  %v3230_v29 = vpop.f32.mrb[46].mxu1  ;;  %v1592_v30 = vmax.f32 %v4456_v26, 0.0  ;;  %4246 = vmatprep.subr.bf16.mxu1 %v4245_v25  ;;  %v1847_v2 = vld [vmem:[%s6011_s7 + $0xd8] sm:$0xff]  ;;  %v4263_v8 = vpack.c.bf16 %v2165_v54, %v2164_v7  ;;  %v2184_v26 = vld [vmem:[%s6011_s7 + $0x220] sm:$0xff] }
 0x237   : > { %v3231_v31 = vpop.f32.mrb[47].mxu1  ;;  %v4217_v49 = vpack.c.bf16 %v1847_v2, %v1846_v47  ;;  %v2188_v2 = vld [vmem:[%s6011_s7 + $0x240] sm:$0xff] }
 0x238   : > { %v3232_v32 = vadd.f32 %v3231_v31, %v3230_v29  ;;  %3760 = vmatmul.mubr.f32.gmra.mrb[52].mxu1 %v1592_v30  ;;  %v4468_v33 = vadd.f32 %v4467_v27, %v1570_v5  ;;  %v1864_v5 = vld [vmem:[%s6011_s7 + $0x160] sm:$0xff]  ;;  %v2185_v27 = vld [vmem:[%s6011_s7 + $0x228] sm:$0xff] }
 0x239   : > { %4248 = vmatpush3.bf16.msra.mxu1 %v4245_v25  ;;  %4218 = vmatprep.subr.bf16.mxu0 %v4217_v49  ;;  %v4253_v19 = vpack.c.bf16 %v1865_v16, %v1864_v5  ;;  %v2166_v25 = vld [vmem:[%s6011_s7 + $0x190] sm:$0xff]  ;;  %v4269_v29 = vpack.c.bf16 %v2185_v27, %v2184_v26  ;;  %v2168_v30 = vld [vmem:[%s6011_s7 + $0x1a0] sm:$0xff]  ;;  %v2169_v31 = vld [vmem:[%s6011_s7 + $0x1a8] sm:$0xff] }
 0x23a   : > { %v4463_v55 = vadd.f32 %v5391_v18, %v3232_v32  ;;  %v1593_v34 = vmax.f32 %v4468_v33, 0.0  ;;  %v1831_v18 = vld [vmem:[%s6011_s7 + $0x58] sm:$0xff]  ;;  %4250 = vmatprep.subr.bf16.mxu1 %v4249_v1  ;;  %v4267_v24 = vpack.c.bf16 %v2167_v28, %v2166_v25  ;;  %v4271_v32 = vpack.c.bf16 %v2169_v31, %v2168_v30  ;;  %v2186_v33 = vld [vmem:[%s6011_s7 + $0x230] sm:$0xff]  ;;  %v2189_v49 = vld [vmem:[%s6011_s7 + $0x248] sm:$0xff] }
 0x23b   : > { %v4219_v41 = vpack.c.bf16 %v1831_v18, %v1830_v37  ;;  %v4277_v37 = vpack.c.bf16 %v2189_v49, %v2188_v2  ;;  %v2172_v18 = vld [vmem:[%s6011_s7 + $0x1c0] sm:$0xff]  ;;  %v2178_v16 = vld [vmem:[%s6011_s7 + $0x1f0] sm:$0xff]  ;;  %v2199_v25 = vld [vmem:[%s6011_s7 + $0x298] sm:$0xff] }
 0x23c   : > { %3762 = vmatprep.mubr.f32.mxu1 %v1593_v34  ;;  %v4464_v35 = vadd.f32 %v4463_v55, %v3720_v11  ;;  %v1835_v11 = vld [vmem:[%s6011_s7 + $0x78] sm:$0xff]  ;;  %v2202_v2 = vld [vmem:[%s6011_s7 + $0x2b0] sm:$0xff] }
 0x23d   : > { %4220 = vmatpush3.bf16.msra.mxu0 %v4219_v41  ;;  %v4227_v14 = vpack.c.bf16 %v1835_v11, %v1834_v6  ;;  %4252 = vmatpush3.bf16.msra.mxu1 %v4249_v1  ;;  %v2187_v55 = vld [vmem:[%s6011_s7 + $0x238] sm:$0xff]  ;;  %v2173_v41 = vld [vmem:[%s6011_s7 + $0x1c8] sm:$0xff]  ;;  %v2194_v11 = vld [vmem:[%s6011_s7 + $0x270] sm:$0xff] }
 0x23e   : > { %v1594_v43 = vmax.f32 %v4464_v35, 0.0  ;;  %4222 = vmatprep.subr.bf16.mxu0 %v4221_v52  ;;  %4254 = vmatprep.subr.bf16.mxu1 %v4253_v19  ;;  %v4273_v34 = vpack.c.bf16 %v2187_v55, %v2186_v33  ;;  %v2170_v35 = vld [vmem:[%s6011_s7 + $0x1b0] sm:$0xff]  ;;  %v4279_v50 = vpack.c.bf16 %v2173_v41, %v2172_v18  ;;  %v2191_v52 = vld [vmem:[%s6011_s7 + $0x258] sm:$0xff]  ;;  %v2193_v1 = vld [vmem:[%s6011_s7 + $0x268] sm:$0xff] }
 0x23f   : > { %v4281_v56 = vpack.c.bf16 %v2191_v52, %v2190_v40  ;;  %v4285_v63 = vpack.c.bf16 %v2193_v1, %v2192_v61  ;;  %v2177_v6 = vld [vmem:[%s6011_s7 + $0x1e8] sm:$0xff]  ;;  %v2204_v41 = vld [vmem:[%s6011_s7 + $0x2c0] sm:$0xff] }
 0x240   : > { %3763 = vmatmul.mubr.f32.gmra.mrb[54].mxu1 %v1594_v43  ;;  %v2171_v43 = vld [vmem:[%s6011_s7 + $0x1b8] sm:$0xff]  ;;  %v2205_v40 = vld [vmem:[%s6011_s7 + $0x2c8] sm:$0xff] }
 0x241   : > { %4224 = vmatpush3.bf16.msra.mxu0 %v4223_v60  ;;  %4256 = vmatpush3.bf16.msra.mxu1 %v4253_v19  ;;  %v4275_v47 = vpack.c.bf16 %v2171_v43, %v2170_v35  ;;  %v2175_v60 = vld [vmem:[%s6011_s7 + $0x1d8] sm:$0xff]  ;;  %v4309_v61 = vpack.c.bf16 %v2205_v40, %v2204_v41  ;;  %v2539_v41 = vld [vmem:[%s6011_s7 + $0x428] sm:$0xff]  ;;  %v2524_v40 = vld [vmem:[%s6011_s7 + $0x3b0] sm:$0xff] }
 0x242   : > { %4226 = vmatprep.subr.bf16.mxu0 %v4225_v10  ;;  %4258 = vmatprep.subr.bf16.mxu1 %v4257_v46  ;;  %v4283_v62 = vpack.c.bf16 %v2175_v60, %v2174_v57  ;;  %v4287_v10 = vpack.c.bf16 %v2177_v6, %v2176_v4  ;;  %v2179_v19 = vld [vmem:[%s6011_s7 + $0x1f8] sm:$0xff]  ;;  %v2206_v4 = vld [vmem:[%s6011_s7 + $0x2d0] sm:$0xff] }
 0x243   : > { %3797 = vmatprep.mubr.f32.mxu1 %v1780_v22  ;;  %v4291_v51 = vpack.c.bf16 %v2179_v19, %v2178_v16  ;;  %v2207_v6 = vld [vmem:[%s6011_s7 + $0x2d8] sm:$0xff]  ;;  %v2209_v19 = vld [vmem:[%s6011_s7 + $0x2e8] sm:$0xff] }
 0x245   : > { %4228 = vmatpush3.bf16.msra.mxu0 %v4227_v14  ;;  %4260 = vmatpush3.bf16.msra.mxu1 %v4257_v46  ;;  %v2195_v14 = vld [vmem:[%s6011_s7 + $0x278] sm:$0xff]  ;;  %v5590_v46 = vld [vmem:[%s6010_s6] ss:$0 sm:$0xff] }
 0x246   : > { %4262 = vmatprep.subr.bf16.mxu0 %v4261_v15  ;;  %4294 = vmatprep.subr.bf16.mxu1 %v5494_v12  ;;  %v4289_v5 = vpack.c.bf16 %v2195_v14, %v2194_v11  ;;  %v4313_v14 = vpack.c.bf16 %v2207_v6, %v2206_v4  ;;  %v2509_v4 = vld [vmem:[%s6011_s7 + $0x338] sm:$0xff]  ;;  %v2540_v6 = vld [vmem:[%s6011_s7 + $0x430] sm:$0xff] }
 0x248   : > { %1933 = vmatmul.mubr.f32.vlgmr.msra.gmra.mrb[16].mxu0 %v1748_v21  ;;  %v2518_v21 = vld [vmem:[%s6011_s7 + $0x380] sm:$0xff] }
 0x249   : > { %4264 = vmatpush3.bf16.msra.mxu0 %v4263_v8  ;;  %v4325_v39 = vpack.c.bf16 %v2519_v23, %v2518_v21 }
 0x24a   : > { %4266 = vmatprep.subr.bf16.mxu0 %v4265_v20  ;;  %v2198_v20 = vld [vmem:[%s6011_s7 + $0x290] sm:$0xff] }
 0x24b   : > { %v4297_v27 = vpack.c.bf16 %v2199_v25, %v2198_v20  ;;  %v2521_v20 = vld [vmem:[%s6011_s7 + $0x398] sm:$0xff] }
 0x24d   : > { %4268 = vmatpush3.bf16.msra.mxu0 %v4267_v24 }
 0x24e   : > { %4270 = vmatprep.subr.bf16.mxu0 %v4269_v29 }
 0x251   : > { %4272 = vmatpush3.bf16.msra.mxu0 %v4271_v32 }
 0x252   : > { %4274 = vmatprep.subr.bf16.mxu0 %v4273_v34 }
 0x255   : > { %4276 = vmatpush3.bf16.msra.mxu0 %v4275_v47 }
 0x256   : > { %4278 = vmatprep.subr.bf16.mxu0 %v4277_v37 }
 0x259   : > { %4280 = vmatpush3.bf16.msra.mxu0 %v4279_v50 }
 0x25a   : > { %4282 = vmatprep.subr.bf16.mxu0 %v4281_v56 }
 0x25d   : > { %4284 = vmatpush3.bf16.msra.mxu0 %v4283_v62 }
 0x25e   : > { %4286 = vmatprep.subr.bf16.mxu0 %v4285_v63 }
 0x261   : > { %4288 = vmatpush3.bf16.msra.mxu0 %v4287_v10 }
 0x262   : > { %4290 = vmatprep.subr.bf16.mxu0 %v4289_v5  ;;  %v2208_v5 = vld [vmem:[%s6011_s7 + $0x2e0] sm:$0xff] }
 0x263   : > { %v4317_v21 = vpack.c.bf16 %v2209_v19, %v2208_v5  ;;  %v2526_v5 = vld [vmem:[%s6011_s7 + $0x3c0] sm:$0xff]  ;;  %v2527_v19 = vld [vmem:[%s6011_s7 + $0x3c8] sm:$0xff] }
 0x265   : > { %4292 = vmatpush3.bf16.msra.mxu0 %v4291_v51 }
 0x266   : > { %4326 = vmatprep.subr.bf16.mxu0 %v4325_v39  ;;  %v2210_v39 = vld [vmem:[%s6011_s7 + $0x2f0] sm:$0xff] }
 0x2fb   : > { %v3755_v45 = vpop.f32.mrb[48].mxu1 }
 0x2fc   : > { %v1690_v58 = vadd.f32 %v3755_v45, %v5590_v46  ;;  %v1684_v15 = vpop.f32.mrb[49].mxu1 }
 0x2fd   : > { %v1685_v7 = vadd.f32 %v5590_v46, %v1684_v15  ;;  %v2503_v15 = vld [vmem:[%s6011_s7 + $0x308] sm:$0xff] }
 0x2fe   : > { %v5595_v54 = vadd.f32 %v1690_v58, %v4943_v36  ;;  %v2502_v58 = vld [vmem:[%s6011_s7 + $0x300] sm:$0xff] }
 0x2ff   : > { %v5598_v8 = vadd.f32 %v1685_v7, %v4945_v38  ;;  %v2534_v7 = vld [vmem:[%s6011_s7 + $0x400] sm:$0xff]  ;;  %v4327_v25 = vpack.c.bf16 %v2503_v15, %v2502_v58  ;;  %v2511_v58 = vld [vmem:[%s6011_s7 + $0x348] sm:$0xff] }
 0x300   : > { %v5601_v9 = vmax.f32 %v5595_v54, 0.0  ;;  %v2542_v15 = vld [vmem:[%s6011_s7 + $0x440] sm:$0xff] }
 0x301   : > { %v5604_v3 = vmax.f32 %v5598_v8, 0.0 }
 0x302   : > { %1740 = vst [vmem:[#allocation3 + $0x21] sm:$0xff] %v5601_v9 }
 0x303   : > { %1739 = vst [vmem:[#allocation3 + $0x11] sm:$0xff] %v5604_v3  ;;  %v3758_v13 = vpop.f32.mrb[50].mxu1  ;;  %1937 = vmatprep.mubr.f32.mxu0 %v5604_v3 }
 0x304   : > { %v1700_v17 = vadd.f32 %v3758_v13, %v5590_v46  ;;  %v1694_v36 = vpop.f32.mrb[51].mxu1 }
 0x305   : > { %v1695_v22 = vadd.f32 %v5590_v46, %v1694_v36  ;;  %v2535_v36 = vld [vmem:[%s6011_s7 + $0x408] sm:$0xff] }
 0x306   : > { %v5612_v38 = vadd.f32 %v1700_v17, %v4954_v42  ;;  %v2200_v42 = vld [vmem:[%s6011_s7 + $0x2a0] sm:$0xff] }
 0x307   : > { %v5621_v28 = vadd.f32 %v1695_v22, %v4957_v44  ;;  %v2201_v44 = vld [vmem:[%s6011_s7 + $0x2a8] sm:$0xff]  ;;  %v2520_v22 = vld [vmem:[%s6011_s7 + $0x390] sm:$0xff] }
 0x308   : > { %v5624_v24 = vmax.f32 %v5612_v38, 0.0  ;;  %v4301_v35 = vpack.c.bf16 %v2201_v44, %v2200_v42  ;;  %v4329_v42 = vpack.c.bf16 %v2521_v20, %v2520_v22  ;;  %v2504_v44 = vld [vmem:[%s6011_s7 + $0x310] sm:$0xff]  ;;  %v2529_v22 = vld [vmem:[%s6011_s7 + $0x3d8] sm:$0xff] }
 0x309   : > { %v5627_v26 = vmax.f32 %v5621_v28, 0.0  ;;  %v5643_v32 = vld [vmem:[#allocation3 + $0x22] sm:$0xff] }
 0x30a   : > { %1742 = vst [vmem:[#allocation3 + $0x41] sm:$0xff] %v5624_v24  ;;  %v5633_v29 = vld [vmem:[#allocation3 + $0x12] sm:$0xff]  ;;  %v5653_v47 = vld [vmem:[#allocation3 + $0x20] sm:$0xff] }
 0x30b   : > { %v5635_v30 = vld [vmem:[#allocation3 + $0x10] sm:$0xff]  ;;  %1741 = vst [vmem:[#allocation3 + $0x31] sm:$0xff] %v5627_v26  ;;  %v3761_v31 = vpop.f32.mrb[52].mxu1  ;;  %3798 = vmatmul.mubr.f32.vlgmr.msra.gmra.mrb[56].mxu1 %v5633_v29 }
 0x30c   : > { %1938 = vmatmul.mubr.f32.gmra.mrb[18].mxu0 %v5635_v30  ;;  %v1710_v33 = vadd.f32 %v3761_v31, %v5590_v46  ;;  %4296 = vmatpush3.bf16.msra.mxu1 %v5494_v12  ;;  %v1704_v55 = vpop.f32.mrb[53].mxu1  ;;  %v2203_v12 = vld [vmem:[%s6011_s7 + $0x2b8] sm:$0xff] }
 0x30d   : > { %3800 = vmatprep.mubr.f32.mxu1 %v5643_v32  ;;  %v1705_v34 = vadd.f32 %v5590_v46, %v1704_v55  ;;  %1942 = vmatprep.mubr.f32.mxu0 %v5601_v9  ;;  %v4305_v18 = vpack.c.bf16 %v2203_v12, %v2202_v2  ;;  %v2505_v31 = vld [vmem:[%s6011_s7 + $0x318] sm:$0xff]  ;;  %v2523_v55 = vld [vmem:[%s6011_s7 + $0x3a8] sm:$0xff]  ;;  %v2506_v2 = vld [vmem:[%s6011_s7 + $0x320] sm:$0xff] }
 0x30e   : > { %4298 = vmatprep.subr.bf16.mxu1 %v4297_v27  ;;  %v5651_v43 = vadd.f32 %v1710_v33, %v4967_v48  ;;  %v2536_v33 = vld [vmem:[%s6011_s7 + $0x410] sm:$0xff]  ;;  %v2507_v12 = vld [vmem:[%s6011_s7 + $0x328] sm:$0xff] }
 0x30f   : > { %v5662_v49 = vadd.f32 %v1705_v34, %v4976_v53  ;;  %v4331_v34 = vpack.c.bf16 %v2505_v31, %v2504_v44 }
 0x310   : > { %1943 = vmatmul.mubr.f32.gmra.mrb[20].mxu0 %v5653_v47  ;;  %v5666_v37 = vmax.f32 %v5651_v43, 0.0  ;;  %4300 = vmatpush3.bf16.msra.mxu1 %v4297_v27  ;;  %v4357_v27 = vpack.c.bf16 %v2535_v36, %v2534_v7  ;;  %v2543_v7 = vld [vmem:[%s6011_s7 + $0x448] sm:$0xff]  ;;  %v2528_v36 = vld [vmem:[%s6011_s7 + $0x3d0] sm:$0xff] }
 0x311   : > { %1947 = vmatprep.mubr.f32.mxu0 %v5627_v26  ;;  %v5670_v48 = vmax.f32 %v5662_v49, 0.0  ;;  %4302 = vmatprep.subr.bf16.mxu1 %v4301_v35  ;;  %v5686_v56 = vld [vmem:[#allocation3 + $0x42] sm:$0xff]  ;;  %v4373_v44 = vpack.c.bf16 %v2543_v7, %v2542_v15  ;;  %v4345_v31 = vpack.c.bf16 %v2529_v22, %v2528_v36 }
 0x312   : > { %1744 = vst [vmem:[#allocation3 + $0x61] sm:$0xff] %v5666_v37  ;;  %v5676_v53 = vld [vmem:[#allocation3 + $0x32] sm:$0xff]  ;;  %v5695_v63 = vld [vmem:[#allocation3 + $0x40] sm:$0xff]  ;;  %v2789_v36 = vld [vmem:[%s6013_s9 + $0x68] sm:$0xff] }
 0x313   : > { %v5678_v50 = vld [vmem:[#allocation3 + $0x30] sm:$0xff]  ;;  %1743 = vst [vmem:[#allocation3 + $0x51] sm:$0xff] %v5670_v48  ;;  %v3764_v52 = vpop.f32.mrb[54].mxu1  ;;  %3801 = vmatmul.mubr.f32.gmra.mrb[58].mxu1 %v5676_v53  ;;  %v2788_v7 = vld [vmem:[%s6013_s9 + $0x60] sm:$0xff] }
 0x314   : > { %1948 = vmatmul.mubr.f32.gmra.mrb[22].mxu0 %v5678_v50  ;;  %v1720_v57 = vadd.f32 %v3764_v52, %v5590_v46  ;;  %4304 = vmatpush3.bf16.msra.mxu1 %v4301_v35  ;;  %v1714_v60 = vpop.f32.mrb[55].mxu1  ;;  %v2525_v52 = vld [vmem:[%s6011_s7 + $0x3b8] sm:$0xff]  ;;  %v4413_v22 = vpack.c.bf16 %v2789_v36, %v2788_v7 }
 0x315   : > { %3803 = vmatprep.mubr.f32.mxu1 %v5686_v56  ;;  %v1715_v62 = vadd.f32 %v5590_v46, %v1714_v60  ;;  %1952 = vmatprep.mubr.f32.mxu0 %v5624_v24  ;;  %v2211_v46 = vld [vmem:[%s6011_s7 + $0x2f8] sm:$0xff] }
 0x316   : > { %4306 = vmatprep.subr.bf16.mxu1 %v4305_v18  ;;  %v5693_v1 = vadd.f32 %v1720_v57, %v4988_v59  ;;  %v4321_v45 = vpack.c.bf16 %v2211_v46, %v2210_v39  ;;  %v4335_v57 = vpack.c.bf16 %v2507_v12, %v2506_v2  ;;  %v4341_v46 = vpack.c.bf16 %v2527_v19, %v2526_v5  ;;  %v2515_v12 = vld [vmem:[%s6011_s7 + $0x368] sm:$0xff] }
 0x317   : > { %v5704_v10 = vadd.f32 %v1715_v62, %v4996_v0  ;;  %v4337_v62 = vpack.c.bf16 %v2525_v52, %v2524_v40  ;;  %v2533_v40 = vld [vmem:[%s6011_s7 + $0x3f8] sm:$0xff] }
 0x318   : > { %1953 = vmatmul.mubr.f32.gmra.mrb[24].mxu0 %v5695_v63  ;;  %v5708_v11 = vmax.f32 %v5693_v1, 0.0  ;;  %4308 = vmatpush3.bf16.msra.mxu1 %v4305_v18  ;;  %v2538_v18 = vld [vmem:[%s6011_s7 + $0x420] sm:$0xff] }
 0x319   : > { %1957 = vmatprep.mubr.f32.mxu0 %v5670_v48  ;;  %v5712_v59 = vmax.f32 %v5704_v10, 0.0  ;;  %4310 = vmatprep.subr.bf16.mxu1 %v4309_v61  ;;  %v5728_v51 = vld [vmem:[#allocation3 + $0x62] sm:$0xff]  ;;  %v4365_v60 = vpack.c.bf16 %v2539_v41, %v2538_v18  ;;  %v2532_v41 = vld [vmem:[%s6011_s7 + $0x3f0] sm:$0xff] }
 0x31a   : > { %1746 = vst [vmem:[#allocation3 + $0x81] sm:$0xff] %v5708_v11  ;;  %v5718_v0 = vld [vmem:[#allocation3 + $0x52] sm:$0xff]  ;;  %v5732_v23 = vld [vmem:[#allocation3 + $0x60] sm:$0xff]  ;;  %v2547_v18 = vld [vmem:[%s6011_s7 + $0x468] sm:$0xff] }
 0x31b   : > { %v5720_v16 = vld [vmem:[#allocation3 + $0x50] sm:$0xff]  ;;  %1745 = vst [vmem:[#allocation3 + $0x71] sm:$0xff] %v5712_v59  ;;  %3804 = vmatmul.mubr.f32.gmra.mrb[60].mxu1 %v5718_v0 }
 0x31c   : > { %1958 = vmatmul.mubr.f32.gmra.mrb[26].mxu0 %v5720_v16  ;;  %4312 = vmatpush3.bf16.msra.mxu1 %v4309_v61  ;;  %v2508_v61 = vld [vmem:[%s6011_s7 + $0x330] sm:$0xff] }
 0x31d   : > { %3806 = vmatprep.mubr.f32.mxu1 %v5728_v51  ;;  %1962 = vmatprep.mubr.f32.mxu0 %v5666_v37 }
 0x31e   : > { %4314 = vmatprep.subr.bf16.mxu1 %v4313_v14 }
 0x320   : > { %1963 = vmatmul.mubr.f32.gmra.mrb[28].mxu0 %v5732_v23  ;;  %4316 = vmatpush3.bf16.msra.mxu1 %v4313_v14  ;;  %v2541_v14 = vld [vmem:[%s6011_s7 + $0x438] sm:$0xff] }
 0x321   : > { %1967 = vmatprep.mubr.f32.mxu0 %v5712_v59  ;;  %4318 = vmatprep.subr.bf16.mxu1 %v4317_v21  ;;  %v4369_v39 = vpack.c.bf16 %v2541_v14, %v2540_v6  ;;  %v2549_v6 = vld [vmem:[%s6011_s7 + $0x478] sm:$0xff]  ;;  %v2099_v19 = vld [vmem:[#allocation3 + $0x80] sm:$0xff] }
 0x322   : > { %v5751_v13 = vld [vmem:[#allocation3 + $0x72] sm:$0xff] }
 0x323   : > { %v5753_v17 = vld [vmem:[#allocation3 + $0x70] sm:$0xff]  ;;  %3807 = vmatmul.mubr.f32.gmra.mrb[62].mxu1 %v5751_v13 }
 0x324   : > { %1968 = vmatmul.mubr.f32.gmra.mrb[30].mxu0 %v5753_v17  ;;  %4320 = vmatpush3.bf16.msra.mxu1 %v4317_v21  ;;  %v4339_v21 = vpack.c.bf16 %v2509_v4, %v2508_v61  ;;  %v2517_v61 = vld [vmem:[%s6011_s7 + $0x378] sm:$0xff]  ;;  %v2548_v4 = vld [vmem:[%s6011_s7 + $0x470] sm:$0xff] }
 0x325   : > { %3841 = vmatprep.mubr.f32.mxu1 %v5633_v29  ;;  %2276 = vmatprep.mubr.f32.mxu0 %v5604_v3  ;;  %v2537_v3 = vld [vmem:[%s6011_s7 + $0x418] sm:$0xff]  ;;  %v2522_v29 = vld [vmem:[%s6011_s7 + $0x3a0] sm:$0xff]  ;;  %v4385_v5 = vpack.c.bf16 %v2549_v6, %v2548_v4 }
 0x326   : > { %4322 = vmatprep.subr.bf16.mxu1 %v4321_v45  ;;  %v4333_v35 = vpack.c.bf16 %v2523_v55, %v2522_v29  ;;  %v2530_v29 = vld [vmem:[%s6011_s7 + $0x3e0] sm:$0xff]  ;;  %v2531_v55 = vld [vmem:[%s6011_s7 + $0x3e8] sm:$0xff] }
 0x327   : > { %v4349_v2 = vpack.c.bf16 %v2531_v55, %v2530_v29  ;;  %v2987_v4 = vld [vmem:[%s6012_s8] ss:$0 sm:$0xff] }
 0x328   : > { %2277 = vmatmul.mubr.f32.vlgmr.msra.gmra.mrb[32].mxu0 %v5635_v30  ;;  %4324 = vmatpush3.bf16.msra.mxu1 %v4321_v45  ;;  %v4361_v30 = vpack.c.bf16 %v2537_v3, %v2536_v33  ;;  %v2510_v45 = vld [vmem:[%s6011_s7 + $0x340] sm:$0xff]  ;;  %v2544_v33 = vld [vmem:[%s6011_s7 + $0x450] sm:$0xff]  ;;  %v2545_v3 = vld [vmem:[%s6011_s7 + $0x458] sm:$0xff] }
 0x329   : > { %4328 = vmatpush3.bf16.msra.mxu0 %v4327_v25  ;;  %2281 = vmatprep.mubr.f32.mxu0 %v5601_v9  ;;  %v4343_v20 = vpack.c.bf16 %v2511_v58, %v2510_v45  ;;  %v2512_v25 = vld [vmem:[%s6011_s7 + $0x350] sm:$0xff]  ;;  %v2787_v58 = vld [vmem:[%s6013_s9 + $0x58] sm:$0xff] }
 0x32a   : > { %4358 = vmatprep.subr.bf16.mxu1 %v4357_v27  ;;  %4330 = vmatprep.subr.bf16.mxu0 %v4329_v42  ;;  %v5860_v42 = vld [vmem:[#allocation3 + $0x82] sm:$0xff]  ;;  %v2786_v45 = vld [vmem:[%s6013_s9 + $0x50] sm:$0xff] }
 0x32b   : > { %3842 = vmatmul.mubr.f32.vlgmr.msra.gmra.mrb[56].mxu1 %v5643_v32  ;;  %v4409_v15 = vpack.c.bf16 %v2787_v58, %v2786_v45 }
 0x32c   : > { %2282 = vmatmul.mubr.f32.gmra.mrb[34].mxu0 %v5653_v47  ;;  %3844 = vmatprep.mubr.f32.mxu1 %v5676_v53 }
 0x32d   : > { %4360 = vmatpush3.bf16.msra.mxu1 %v4357_v27  ;;  %4332 = vmatpush3.bf16.msra.mxu0 %v4331_v34  ;;  %v2513_v27 = vld [vmem:[%s6011_s7 + $0x358] sm:$0xff] }
 0x32e   : > { %2286 = vmatprep.mubr.f32.mxu0 %v5627_v26  ;;  %4362 = vmatprep.subr.bf16.mxu1 %v4361_v30  ;;  %v4347_v34 = vpack.c.bf16 %v2513_v27, %v2512_v25  ;;  %v2791_v25 = vld [vmem:[%s6013_s9 + $0x78] sm:$0xff] }
 0x32f   : > { %4334 = vmatprep.subr.bf16.mxu0 %v4333_v35  ;;  %3845 = vmatmul.mubr.f32.gmra.mrb[58].mxu1 %v5686_v56  ;;  %v2514_v35 = vld [vmem:[%s6011_s7 + $0x360] sm:$0xff] }
 0x330   : > { %2287 = vmatmul.mubr.f32.gmra.mrb[36].mxu0 %v5678_v50  ;;  %3847 = vmatprep.mubr.f32.mxu1 %v5718_v0  ;;  %v4351_v52 = vpack.c.bf16 %v2515_v12, %v2514_v35 }
 0x331   : > { %4364 = vmatpush3.bf16.msra.mxu1 %v4361_v30  ;;  %4336 = vmatpush3.bf16.msra.mxu0 %v4335_v57  ;;  %v4377_v30 = vpack.c.bf16 %v2545_v3, %v2544_v33 }
 0x332   : > { %2291 = vmatprep.mubr.f32.mxu0 %v5624_v24  ;;  %4366 = vmatprep.subr.bf16.mxu1 %v4365_v60 }
 0x333   : > { %4338 = vmatprep.subr.bf16.mxu0 %v4337_v62  ;;  %3848 = vmatmul.mubr.f32.gmra.mrb[60].mxu1 %v5728_v51  ;;  %v4353_v62 = vpack.c.bf16 %v2533_v40, %v2532_v41 }
 0x334   : > { %2292 = vmatmul.mubr.f32.gmra.mrb[38].mxu0 %v5695_v63  ;;  %3850 = vmatprep.mubr.f32.mxu1 %v5751_v13 }
 0x335   : > { %4368 = vmatpush3.bf16.msra.mxu1 %v4365_v60  ;;  %4340 = vmatpush3.bf16.msra.mxu0 %v4339_v21  ;;  %v2516_v60 = vld [vmem:[%s6011_s7 + $0x370] sm:$0xff]  ;;  %v2784_v21 = vld [vmem:[%s6013_s9 + $0x40] sm:$0xff] }
 0x336   : > { %2296 = vmatprep.mubr.f32.mxu0 %v5670_v48  ;;  %4370 = vmatprep.subr.bf16.mxu1 %v4369_v39  ;;  %v4355_v14 = vpack.c.bf16 %v2517_v61, %v2516_v60 }
 0x337   : > { %4342 = vmatprep.subr.bf16.mxu0 %v4341_v46  ;;  %3851 = vmatmul.mubr.f32.gmra.mrb[62].mxu1 %v5860_v42 }
 0x338   : > { %2297 = vmatmul.mubr.f32.gmra.mrb[40].mxu0 %v5720_v16  ;;  %3885 = vmatprep.mubr.f32.mxu1 %v5643_v32  ;;  %v2546_v32 = vld [vmem:[%s6011_s7 + $0x460] sm:$0xff] }
 0x339   : > { %4372 = vmatpush3.bf16.msra.mxu1 %v4369_v39  ;;  %4344 = vmatpush3.bf16.msra.mxu0 %v4343_v20  ;;  %v4381_v57 = vpack.c.bf16 %v2547_v18, %v2546_v32  ;;  %v2785_v39 = vld [vmem:[%s6013_s9 + $0x48] sm:$0xff]  ;;  %v2790_v20 = vld [vmem:[%s6013_s9 + $0x70] sm:$0xff] }
 0x33a   : > { %2301 = vmatprep.mubr.f32.mxu0 %v5666_v37  ;;  %4374 = vmatprep.subr.bf16.mxu1 %v4373_v44  ;;  %v4405_v46 = vpack.c.bf16 %v2785_v39, %v2784_v21  ;;  %v4417_v27 = vpack.c.bf16 %v2791_v25, %v2790_v20 }
 0x33b   : > { %4346 = vmatprep.subr.bf16.mxu0 %v4345_v31 }
 0x33c   : > { %2302 = vmatmul.mubr.f32.gmra.mrb[42].mxu0 %v5732_v23 }
 0x33d   : > { %4376 = vmatpush3.bf16.msra.mxu1 %v4373_v44  ;;  %2306 = vmatprep.mubr.f32.mxu0 %v5712_v59 }
 0x33e   : > { %4348 = vmatpush3.bf16.msra.mxu0 %v4347_v34  ;;  %4378 = vmatprep.subr.bf16.mxu1 %v4377_v30 }
 0x33f   : > { %4350 = vmatprep.subr.bf16.mxu0 %v4349_v2 }
 0x340   : > { %2307 = vmatmul.mubr.f32.gmra.mrb[44].mxu0 %v5753_v17 }
 0x341   : > { %4380 = vmatpush3.bf16.msra.mxu1 %v4377_v30  ;;  %2311 = vmatprep.mubr.f32.mxu0 %v5708_v11 }
 0x342   : > { %4352 = vmatpush3.bf16.msra.mxu0 %v4351_v52  ;;  %4382 = vmatprep.subr.bf16.mxu1 %v4381_v57 }
 0x343   : > { %4354 = vmatprep.subr.bf16.mxu0 %v4353_v62 }
 0x344   : > { %2312 = vmatmul.mubr.f32.gmra.mrb[46].mxu0 %v2099_v19 }
 0x345   : > { %4384 = vmatpush3.bf16.msra.mxu1 %v4381_v57  ;;  %2614 = vmatprep.mubr.f32.mxu0 %v5601_v9  ;;  %v2469_v9 = vld [vmem:[#allocation3 + $0x92] sm:$0xff] }
 0x346   : > { %4356 = vmatpush3.bf16.msra.mxu0 %v4355_v14  ;;  %4386 = vmatprep.subr.bf16.mxu1 %v4385_v5 }
 0x349   : > { %4388 = vmatpush3.bf16.msra.mxu1 %v4385_v5  ;;  %2615 = vmatmul.mubr.f32.vlgmr.msra.gmra.mrb[48].mxu0 %v5653_v47 }
 0x34a   : > { %2619 = vmatprep.mubr.f32.mxu0 %v5627_v26  ;;  %v3313_v26 = vpop.f32.mrb[16].mxu0 }
 0x34c   : > { %3886 = vmatmul.mubr.f32.vlgmr.msra.gmra.mrb[56].mxu1 %v5676_v53  ;;  %v2437_v53 = vld [vmem:[#allocation3 + $0x90] sm:$0xff] }
 0x34d   : > { %3888 = vmatprep.mubr.f32.mxu1 %v5686_v56  ;;  %2620 = vmatmul.mubr.f32.gmra.mrb[50].mxu0 %v5678_v50  ;;  %v2777_v50 = vld [vmem:[%s6013_s9 + $0x8] sm:$0xff] }
 0x34e   : > { %2624 = vmatprep.mubr.f32.mxu0 %v5624_v24  ;;  %v3314_v24 = vpop.f32.mrb[17].mxu0 }
 0x34f   : > { %v5928_v47 = vadd.f32 %v3314_v24, %v3313_v26 }
 0x350   : > { %3889 = vmatmul.mubr.f32.gmra.mrb[58].mxu1 %v5718_v0  ;;  %v2780_v0 = vld [vmem:[%s6013_s9 + $0x20] sm:$0xff] }
 0x351   : > { %3891 = vmatprep.mubr.f32.mxu1 %v5728_v51  ;;  %2625 = vmatmul.mubr.f32.gmra.mrb[52].mxu0 %v5695_v63  ;;  %v2778_v63 = vld [vmem:[%s6013_s9 + $0x10] sm:$0xff]  ;;  %v4473_v5 = vadd.f32 %v5928_v47, %v2987_v4 }
 0x352   : > { %2629 = vmatprep.mubr.f32.mxu0 %v5670_v48  ;;  %v2453_v48 = vld [vmem:[#allocation3 + $0x91] sm:$0xff] }
 0x354   : > { %3892 = vmatmul.mubr.f32.gmra.mrb[60].mxu1 %v5751_v13  ;;  %v2783_v13 = vld [vmem:[%s6013_s9 + $0x38] sm:$0xff] }
 0x355   : > { %3894 = vmatprep.mubr.f32.mxu1 %v5860_v42  ;;  %2630 = vmatmul.mubr.f32.gmra.mrb[54].mxu0 %v5720_v16  ;;  %v2781_v16 = vld [vmem:[%s6013_s9 + $0x28] sm:$0xff] }
 0x356   : > { %2634 = vmatprep.mubr.f32.mxu0 %v5666_v37  ;;  %v2776_v37 = vld [vmem:[%s6013_s9] sm:$0xff]  ;;  %v4397_v51 = vpack.c.bf16 %v2781_v16, %v2780_v0 }
 0x357   : > { %v4389_v56 = vpack.c.bf16 %v2777_v50, %v2776_v37 }
 0x358   : > { %3895 = vmatmul.mubr.f32.gmra.mrb[62].mxu1 %v2469_v9 }
 0x359   : > { %2635 = vmatmul.mubr.f32.gmra.mrb[56].mxu0 %v5732_v23  ;;  %4390 = vmatprep.subr.bf16.mxu0 %v4389_v56  ;;  %v2782_v23 = vld [vmem:[%s6013_s9 + $0x30] sm:$0xff] }
 0x35a   : > { %2639 = vmatprep.mubr.f32.mxu0 %v5712_v59  ;;  %4421 = vmatprep.subr.bf16.mxu1 %v4389_v56 }
 0x35b   : > { %4392 = vmatpush3.bf16.msra.mxu0 %v4389_v56  ;;  %4429 = vmatpush3.bf16.msra.mxu1 %v4389_v56 }
 0x35d   : > { %2640 = vmatmul.mubr.f32.gmra.mrb[58].mxu0 %v5753_v17  ;;  %v4401_v17 = vpack.c.bf16 %v2783_v13, %v2782_v23 }
 0x35e   : > { %2644 = vmatprep.mubr.f32.mxu0 %v5708_v11  ;;  %v2779_v11 = vld [vmem:[%s6013_s9 + $0x18] sm:$0xff] }
 0x35f   : > { %v4393_v59 = vpack.c.bf16 %v2779_v11, %v2778_v63 }
 0x361   : > { %2645 = vmatmul.mubr.f32.gmra.mrb[60].mxu0 %v2099_v19  ;;  %4394 = vmatprep.subr.bf16.mxu0 %v4393_v59 }
 0x362   : > { %2649 = vmatprep.mubr.f32.mxu0 %v2453_v48  ;;  %4422 = vmatprep.subr.bf16.mxu1 %v4393_v59 }
 0x363   : > { %4396 = vmatpush3.bf16.msra.mxu0 %v4393_v59  ;;  %4430 = vmatpush3.bf16.msra.mxu1 %v4393_v59 }
 0x364   : > { %4398 = vmatprep.subr.bf16.mxu0 %v4397_v51  ;;  %4423 = vmatprep.subr.bf16.mxu1 %v4397_v51 }
 0x365   : > { %2650 = vmatmul.mubr.f32.gmra.mrb[62].mxu0 %v2437_v53 }
 0x367   : > { %4400 = vmatpush3.bf16.msra.mxu0 %v4397_v51  ;;  %4431 = vmatpush3.bf16.msra.mxu1 %v4397_v51 }
 0x368   : > { %4402 = vmatprep.subr.bf16.mxu0 %v4401_v17  ;;  %4424 = vmatprep.subr.bf16.mxu1 %v4401_v17 }
 0x36b   : > { %4404 = vmatpush3.bf16.msra.mxu0 %v4401_v17  ;;  %4432 = vmatpush3.bf16.msra.mxu1 %v4401_v17 }
 0x36c   : > { %4406 = vmatprep.subr.bf16.mxu0 %v4405_v46  ;;  %4425 = vmatprep.subr.bf16.mxu1 %v4405_v46 }
 0x36f   : > { %4408 = vmatpush3.bf16.msra.mxu0 %v4405_v46  ;;  %4433 = vmatpush3.bf16.msra.mxu1 %v4405_v46 }
 0x370   : > { %4410 = vmatprep.subr.bf16.mxu0 %v4409_v15  ;;  %4426 = vmatprep.subr.bf16.mxu1 %v4409_v15 }
 0x373   : > { %4412 = vmatpush3.bf16.msra.mxu0 %v4409_v15  ;;  %4434 = vmatpush3.bf16.msra.mxu1 %v4409_v15 }
 0x374   : > { %4414 = vmatprep.subr.bf16.mxu0 %v4413_v22  ;;  %4427 = vmatprep.subr.bf16.mxu1 %v4413_v22 }
 0x377   : > { %4416 = vmatpush3.bf16.msra.mxu0 %v4413_v22  ;;  %4435 = vmatpush3.bf16.msra.mxu1 %v4413_v22 }
 0x378   : > { %4418 = vmatprep.subr.bf16.mxu0 %v4417_v27  ;;  %4428 = vmatprep.subr.bf16.mxu1 %v4417_v27 }
 0x37b   : > { %4420 = vmatpush3.bf16.msra.mxu0 %v4417_v27  ;;  %4436 = vmatpush3.bf16.msra.mxu1 %v4417_v27 }
 0x3df   : > { %v3316_v42 = vpop.f32.mrb[18].mxu0 }
 0x3e0   : > { %v3317_v44 = vpop.f32.mrb[19].mxu0 }
 0x3e1   : > { %v3318_v31 = vadd.f32 %v3317_v44, %v3316_v42 }
 0x3e3   : > { %v3319_v33 = vpop.f32.mrb[20].mxu0  ;;  %v4469_v48 = vadd.f32 %v3318_v31, %v2987_v4 }
 0x3e4   : > { %v3320_v3 = vpop.f32.mrb[21].mxu0 }
 0x3e5   : > { %v3321_v29 = vadd.f32 %v3320_v3, %v3319_v33 }
 0x3e7   : > { %v3322_v55 = vpop.f32.mrb[22].mxu0  ;;  %v4481_v63 = vadd.f32 %v3321_v29, %v2987_v4 }
 0x3e8   : > { %v3323_v34 = vpop.f32.mrb[23].mxu0 }
 0x3e9   : > { %v3324_v30 = vadd.f32 %v3323_v34, %v3322_v55 }
 0x3eb   : > { %v3325_v35 = vpop.f32.mrb[24].mxu0  ;;  %v4477_v51 = vadd.f32 %v3324_v30, %v2987_v4 }
 0x3ec   : > { %v3326_v2 = vpop.f32.mrb[25].mxu0 }
 0x3ed   : > { %v3327_v12 = vadd.f32 %v3326_v2, %v3325_v35 }
 0x3ef   : > { %v3328_v32 = vpop.f32.mrb[26].mxu0  ;;  %v4489_v47 = vadd.f32 %v3327_v12, %v2987_v4 }
 0x3f0   : > { %v3329_v18 = vpop.f32.mrb[27].mxu0 }
 0x3f1   : > { %v3330_v41 = vadd.f32 %v3329_v18, %v3328_v32 }
 0x3f3   : > { %v3331_v40 = vpop.f32.mrb[28].mxu0  ;;  %v4485_v15 = vadd.f32 %v3330_v41, %v2987_v4 }
 0x3f4   : > { %v3332_v52 = vpop.f32.mrb[29].mxu0 }
 0x3f5   : > { %v3333_v57 = vadd.f32 %v3332_v52, %v3331_v40 }
 0x3f7   : > { %v3334_v60 = vpop.f32.mrb[30].mxu0  ;;  %v4497_v25 = vadd.f32 %v3333_v57, %v2987_v4 }
 0x3f8   : > { %v3335_v62 = vpop.f32.mrb[31].mxu0 }
 0x3f9   : > { %v3336_v61 = vadd.f32 %v3335_v62, %v3334_v60 }
 0x3fb   : > { %v3393_v6 = vpop.f32.mrb[32].mxu0  ;;  %v4493_v33 = vadd.f32 %v3336_v61, %v2987_v4 }
 0x3fc   : > { %v3394_v14 = vpop.f32.mrb[33].mxu0 }
 0x3fd   : > { %v3395_v19 = vadd.f32 %v3394_v14, %v3393_v6 }
 0x3ff   : > { %v4474_v9 = vadd.f32 %v4473_v5, %v3395_v19  ;;  %v3396_v26 = vpop.f32.mrb[34].mxu0 }
 0x400   : > { %v3397_v24 = vpop.f32.mrb[35].mxu0 }
 0x401   : > { %v3398_v53 = vadd.f32 %v3397_v24, %v3396_v26 }
 0x403   : > { %v4470_v37 = vadd.f32 %v4469_v48, %v3398_v53  ;;  %v3399_v50 = vpop.f32.mrb[36].mxu0 }
 0x404   : > { %v3400_v56 = vpop.f32.mrb[37].mxu0 }
 0x405   : > { %v3401_v11 = vadd.f32 %v3400_v56, %v3399_v50 }
 0x407   : > { %v4482_v59 = vadd.f32 %v4481_v63, %v3401_v11  ;;  %v3402_v0 = vpop.f32.mrb[38].mxu0 }
 0x408   : > { %v3403_v16 = vpop.f32.mrb[39].mxu0 }
 0x409   : > { %v3404_v23 = vadd.f32 %v3403_v16, %v3402_v0 }
 0x40b   : > { %v4478_v13 = vadd.f32 %v4477_v51, %v3404_v23  ;;  %v3405_v17 = vpop.f32.mrb[40].mxu0 }
 0x40c   : > { %v3406_v21 = vpop.f32.mrb[41].mxu0 }
 0x40d   : > { %v3407_v39 = vadd.f32 %v3406_v21, %v3405_v17 }
 0x40f   : > { %v4490_v46 = vadd.f32 %v4489_v47, %v3407_v39  ;;  %v3408_v45 = vpop.f32.mrb[42].mxu0 }
 0x410   : > { %v3409_v58 = vpop.f32.mrb[43].mxu0 }
 0x411   : > { %v3410_v7 = vadd.f32 %v3409_v58, %v3408_v45 }
 0x413   : > { %v4486_v36 = vadd.f32 %v4485_v15, %v3410_v7  ;;  %v3411_v22 = vpop.f32.mrb[44].mxu0 }
 0x414   : > { %v3412_v20 = vpop.f32.mrb[45].mxu0 }
 0x415   : > { %v3413_v27 = vadd.f32 %v3412_v20, %v3411_v22 }
 0x417   : > { %v4498_v42 = vadd.f32 %v4497_v25, %v3413_v27  ;;  %v3414_v44 = vpop.f32.mrb[46].mxu0 }
 0x418   : > { %v3415_v31 = vpop.f32.mrb[47].mxu0 }
 0x419   : > { %v3416_v3 = vadd.f32 %v3415_v31, %v3414_v44 }
 0x41b   : > { %v4494_v29 = vadd.f32 %v4493_v33, %v3416_v3 }
 0x41c   : > { %v3473_v55 = vpop.f32.mrb[48].mxu0 }
 0x41d   : > { %v3474_v34 = vpop.f32.mrb[49].mxu0 }
 0x41e   : > { %v3475_v30 = vadd.f32 %v3474_v34, %v3473_v55 }
 0x41f   : > { %v3887_v35 = vpop.f32.mrb[56].mxu1 }
 0x420   : > { %v2721_v2 = vpop.f32.mrb[57].mxu1  ;;  %v4475_v12 = vadd.f32 %v4474_v9, %v3475_v30  ;;  %v3476_v32 = vpop.f32.mrb[50].mxu0 }
 0x421   : > { %v3477_v18 = vpop.f32.mrb[51].mxu0 }
 0x422   : > { %v4476_v41 = vadd.f32 %v4475_v12, %v2721_v2  ;;  %v3478_v40 = vadd.f32 %v3477_v18, %v3476_v32 }
 0x423   : > { %v3890_v52 = vpop.f32.mrb[58].mxu1 }
 0x424   : > { %v2768_v60 = vmax.f32 %v4476_v41, 0.0  ;;  %v4471_v57 = vadd.f32 %v4470_v37, %v3478_v40  ;;  %v2731_v62 = vpop.f32.mrb[59].mxu1  ;;  %v3479_v6 = vpop.f32.mrb[52].mxu0 }
 0x425   : > { %v3480_v14 = vpop.f32.mrb[53].mxu0 }
 0x426   : > { %v4472_v5 = vadd.f32 %v4471_v57, %v3887_v35  ;;  %v3481_v61 = vadd.f32 %v3480_v14, %v3479_v6  ;;  %3929 = vmatprep.mubr.f32.mxu0 %v2768_v60 }
 0x427   : > { %v3893_v4 = vpop.f32.mrb[60].mxu1 }
 0x428   : > { %v2769_v19 = vmax.f32 %v4472_v5, 0.0  ;;  %v4483_v26 = vadd.f32 %v4482_v59, %v3481_v61  ;;  %v2741_v24 = vpop.f32.mrb[61].mxu1  ;;  %v3482_v48 = vpop.f32.mrb[54].mxu0 }
 0x429   : > { %v3483_v53 = vpop.f32.mrb[55].mxu0 }
 0x42a   : > { %v3484_v9 = vadd.f32 %v3483_v53, %v3482_v48  ;;  %3930 = vmatmul.mubr.f32.vlgmr.msra.gmra.mrb[64].mxu0 %v2769_v19  ;;  %v4484_v50 = vadd.f32 %v4483_v26, %v2731_v62 }
 0x42b   : > { %v3896_v56 = vpop.f32.mrb[62].mxu1 }
 0x42c   : > { %v4479_v63 = vadd.f32 %v4478_v13, %v3484_v9  ;;  %v2751_v11 = vpop.f32.mrb[63].mxu1  ;;  %v3485_v0 = vpop.f32.mrb[56].mxu0  ;;  %v2770_v37 = vmax.f32 %v4484_v50, 0.0 }
 0x42d   : > { %v3486_v16 = vpop.f32.mrb[57].mxu0 }
 0x42e   : > { %v3487_v51 = vadd.f32 %v3486_v16, %v3485_v0  ;;  %3932 = vmatprep.mubr.f32.mxu0 %v2770_v37  ;;  %v4480_v23 = vadd.f32 %v4479_v63, %v3890_v52 }
 0x430   : > { %v4491_v17 = vadd.f32 %v4490_v46, %v3487_v51  ;;  %v3488_v21 = vpop.f32.mrb[58].mxu0  ;;  %v2771_v47 = vmax.f32 %v4480_v23, 0.0 }
 0x431   : > { %v3489_v39 = vpop.f32.mrb[59].mxu0 }
 0x432   : > { %v3490_v59 = vadd.f32 %v3489_v39, %v3488_v21  ;;  %3933 = vmatmul.mubr.f32.gmra.mrb[66].mxu0 %v2771_v47  ;;  %v4492_v45 = vadd.f32 %v4491_v17, %v2741_v24 }
 0x434   : > { %v4487_v58 = vadd.f32 %v4486_v36, %v3490_v59  ;;  %v3491_v15 = vpop.f32.mrb[60].mxu0  ;;  %v2772_v7 = vmax.f32 %v4492_v45, 0.0  ;;  %v2988_v36 = vld [vmem:[%s6014_s10] ss:$0 sm:$0xff] }
 0x435   : > { %v3492_v22 = vpop.f32.mrb[61].mxu0 }
 0x436   : > { %v4488_v20 = vadd.f32 %v4487_v58, %v3893_v4  ;;  %v3493_v13 = vadd.f32 %v3492_v22, %v3491_v15  ;;  %3935 = vmatprep.mubr.f32.mxu1 %v2772_v7 }
 0x438   : > { %v2773_v25 = vmax.f32 %v4488_v20, 0.0  ;;  %v4499_v27 = vadd.f32 %v4498_v42, %v3493_v13  ;;  %v3494_v44 = vpop.f32.mrb[62].mxu0 }
 0x439   : > { %v3495_v31 = vpop.f32.mrb[63].mxu0 }
 0x43a   : > { %v3496_v33 = vadd.f32 %v3495_v31, %v3494_v44  ;;  %3936 = vmatmul.mubr.f32.vlgmr.msra.gmra.mrb[64].mxu1 %v2773_v25  ;;  %v4500_v46 = vadd.f32 %v4499_v27, %v2751_v11 }
 0x43c   : > { %v4495_v3 = vadd.f32 %v4494_v29, %v3496_v33  ;;  %v2774_v55 = vmax.f32 %v4500_v46, 0.0 }
 0x43e   : > { %3938 = vmatprep.mubr.f32.mxu1 %v2774_v55  ;;  %v4496_v34 = vadd.f32 %v4495_v3, %v3896_v56 }
 0x440   : > { %v2775_v30 = vmax.f32 %v4496_v34, 0.0 }
 0x442   : > { %3939 = vmatmul.mubr.f32.gmra.mrb[66].mxu1 %v2775_v30 }
 0x4fd   : > { %v3931_v35 = vpop.f32.mrb[64].mxu0 }
 0x4fe   : > { %v2871_v2 = vadd.f32 %v3931_v35, %v2988_v36  ;;  %v2865_v12 = vpop.f32.mrb[65].mxu0 }
 0x4ff   : > { %v2866_v42 = vadd.f32 %v2988_v36, %v2865_v12 }
 0x500   : > { %v2905_v29 = vadd.f32 %v2871_v2, %v5595_v54 }
 0x501   : > { %v2904_v32 = vadd.f32 %v2866_v42, %v5598_v8 }
 0x502   : > { %2913 = vst [vmem:[%s386_s23 + $0x8] sm:$0xff] %v2905_v29 }
 0x503   : > { %2912 = vst [vmem:[%s386_s23] sm:$0xff] %v2904_v32 }
 0x505   : > { %v3934_v18 = vpop.f32.mrb[66].mxu0 }
 0x506   : > { %v2881_v41 = vadd.f32 %v3934_v18, %v2988_v36  ;;  %v2875_v40 = vpop.f32.mrb[67].mxu0 }
 0x507   : > { %v2876_v52 = vadd.f32 %v2988_v36, %v2875_v40 }
 0x508   : > { %v2907_v60 = vadd.f32 %v2881_v41, %v5612_v38 }
 0x509   : > { %v2906_v57 = vadd.f32 %v2876_v52, %v5621_v28 }
 0x50a   : > { %2915 = vst [vmem:[%s386_s23 + $0x18] sm:$0xff] %v2907_v60 }
 0x50b   : > { %2914 = vst [vmem:[%s386_s23 + $0x10] sm:$0xff] %v2906_v57 }
 0x50d   : > { %v3937_v62 = vpop.f32.mrb[64].mxu1 }
 0x50e   : > { %v2891_v6 = vadd.f32 %v3937_v62, %v2988_v36  ;;  %v2885_v14 = vpop.f32.mrb[65].mxu1 }
 0x50f   : > { %v2886_v5 = vadd.f32 %v2988_v36, %v2885_v14 }
 0x510   : > { %v2909_v54 = vadd.f32 %v2891_v6, %v5651_v43 }
 0x511   : > { %v2908_v8 = vadd.f32 %v2886_v5, %v5662_v49 }
 0x512   : > { %2917 = vst [vmem:[%s386_s23 + $0x28] sm:$0xff] %v2909_v54 }
 0x513   : > { %2916 = vst [vmem:[%s386_s23 + $0x20] sm:$0xff] %v2908_v8 }
 0x515   : > { %v3940_v61 = vpop.f32.mrb[66].mxu1 }
 0x516   : > { %v2901_v4 = vadd.f32 %v3940_v61, %v2988_v36  ;;  %v2895_v19 = vpop.f32.mrb[67].mxu1 }
 0x517   : > { %v2896_v26 = vadd.f32 %v2988_v36, %v2895_v19 }
 0x518   : > { %v2911_v38 = vadd.f32 %v2901_v4, %v5693_v1 }
 0x519   : > { %v2910_v28 = vadd.f32 %v2896_v26, %v5704_v10 }
 0x51a   : > { %2919 = vst [vmem:[%s386_s23 + $0x38] sm:$0xff] %v2911_v38 }
 0x51b   : > { %2918 = vst [vmem:[%s386_s23 + $0x30] sm:$0xff] %v2910_v28 }
 0x51c PF: > { %s21_s17 = sadd.s32 1, %s4548_s17  }
 0x51d   : > { %p18_p4 = scmp.ge.s32.totalorder %s21_s17, 4  }
 0x51f   :  { %20 = sbr.rel (!%p18_p4) target bundleno = 1 (0x1), region = 97 }

</bundles_post_ra>
